<compile_context>
chip_gen: v5e
topology: v5e:2x2
jax: 0.10.0
libtpu: 0.0.40
codegen_flags: <defaults>
</compile_context>

<pallas_src>
import functools

import jax
import jax.numpy as jnp
from jax.experimental import pallas as pl
from jax.experimental.pallas import tpu as pltpu


def _robot_arm_kernel(H, T, Bblk,
                      x_ref,        # (T, Bblk, S)   time-major, batch padded
                      w_ih1_ref,    # (S, 4H)
                      w_hh1_ref,    # (H, 4H)
                      b1_ref,       # (1, 4H)        b_ih_l0 + b_hh_l0
                      w_ih2_ref,    # (H, 4H)
                      w_hh2_ref,    # (H, 4H)
                      b2_ref,       # (1, 4H)        b_ih_l1 + b_hh_l1
                      w_head_ref,   # (H, H)         Wv.T @ Wo.T @ Wfc1.T (folded)
                      b_head_ref,   # (1, H)
                      wf2_ref,      # (H, A)
                      bf2_ref,      # (1, A)
                      out_ref):     # (Bblk, A)
    S = x_ref.shape[-1]

    # ---- (1)+(2) hoisted layer-1 input projection, one matmul for all steps.
    # Bblk is a multiple of 8, so both reshapes are sublane-tile-aligned views.
    x2 = x_ref[...].reshape(T * Bblk, S)
    x_proj = (jnp.dot(x2, w_ih1_ref[...], preferred_element_type=jnp.float32)
              + b1_ref[...])
    x_proj = x_proj.reshape(T, Bblk, 4 * H)      # per-step full (Bblk, 4H) tiles

    w_hh1 = w_hh1_ref[...]
    w_ih2 = w_ih2_ref[...]
    w_hh2 = w_hh2_ref[...]
    # (5) hoist the b2 broadcast out of the unrolled loop.
    b2_b = jnp.broadcast_to(b2_ref[...], (Bblk, 4 * H))

    def gates_to_hc(g, c_prev):
        # (4) two full-vreg EUP launches; gate extraction is cheap lane selects.
        # PyTorch LSTM gate order: input, forget, cell(g), output.
        sig = jax.nn.sigmoid(g)
        th = jnp.tanh(g)
        i = sig[:, 0 * H:1 * H]
        f = sig[:, 1 * H:2 * H]
        gg = th[:, 2 * H:3 * H]
        o = sig[:, 3 * H:4 * H]
        c = f * c_prev + i * gg
        h = o * jnp.tanh(c)
        return h, c

    zeros = jnp.zeros((Bblk, H), jnp.float32)
    h1, c1, h2, c2 = zeros, zeros, zeros, zeros

    # ---- fully unrolled recurrence (T is small & static) --------------------
    for t in range(T):
        g1 = x_proj[t] + jnp.dot(h1, w_hh1, preferred_element_type=jnp.float32)
        h1, c1 = gates_to_hc(g1, c1)

        # (3) no concat: two independent MXU pushes + one VPU add.
        g2 = (jnp.dot(h1, w_ih2, preferred_element_type=jnp.float32)
              + jnp.dot(h2, w_hh2, preferred_element_type=jnp.float32)
              + b2_b)
        h2, c2 = gates_to_hc(g2, c2)

    # ---- folded head: len-1 attention softmax == 1, so attn+fc1 is one affine.
    hidden = jnp.maximum(
        jnp.dot(h2, w_head_ref[...], preferred_element_type=jnp.float32)
        + b_head_ref[...],
        0.0)
    out_ref[...] = (jnp.dot(hidden, wf2_ref[...],
                            preferred_element_type=jnp.float32)
                    + bf2_ref[...])


def robot_arm_lstm_forward(x, params, *, batch_block=8):
    """x: (B, T, state_dim) float32 (batch_first, like the PyTorch module)."""
    B, T, S = x.shape
    H = params["hidden_dim"]
    A = params["action_dim"]

    # (1) pad batch to a multiple of the sublane tile / batch block.
    Bblk = max(8, (batch_block // 8) * 8)
    B_pad = ((B + Bblk - 1) // Bblk) * Bblk
    n_blocks = B_pad // Bblk

    # Time-major so per-step activations are (Bblk, ·) full tiles.
    x_tm = jnp.transpose(x, (1, 0, 2)).astype(jnp.float32)      # (T, B, S)
    if B_pad != B:
        x_tm = jnp.pad(x_tm, ((0, 0), (0, B_pad - B), (0, 0)))

    weight_args = (
        params["w_ih1_t"], params["w_hh1_t"], params["b1"],
        params["w_ih2_t"], params["w_hh2_t"], params["b2"],
        params["w_head"], params["b_head"],
        params["wf2_t"], params["bf2"],
    )

    def w_spec(arr):
        n = arr.ndim
        # Constant index_map -> weights stay VMEM-resident across grid steps.
        return pl.BlockSpec(arr.shape, lambda b, n=n: (0,) * n)

    out = pl.pallas_call(
        functools.partial(_robot_arm_kernel, H, T, Bblk),
        out_shape=jax.ShapeDtypeStruct((B_pad, A), jnp.float32),
        grid=(n_blocks,),
        in_specs=[pl.BlockSpec((T, Bblk, S), lambda b: (0, b, 0))]
                 + [w_spec(a) for a in weight_args],
        out_specs=pl.BlockSpec((Bblk, A), lambda b: (b, 0)),
        compiler_params=pltpu.CompilerParams(
            # (6) batch blocks are independent: parallel axis (v7x 2nd TC when
            # n_blocks > 1; neutral on single-TC v5e/v6e).
            dimension_semantics=("parallel",)),
    )(x_tm, *weight_args)
    return out[:B]


def init_params(key, state_dim, action_dim, hidden_dim):
    H = hidden_dim
    scale = 1.0 / (H ** 0.5)
    ks = jax.random.split(key, 20)

    def u(k, shape):
        return jax.random.uniform(k, shape, jnp.float32, -scale, scale)

    # PyTorch parameter shapes.
    w_ih_l0 = u(ks[0], (4 * H, state_dim))
    w_hh_l0 = u(ks[1], (4 * H, H))
    b_ih_l0 = u(ks[2], (4 * H,))
    b_hh_l0 = u(ks[3], (4 * H,))
    w_ih_l1 = u(ks[4], (4 * H, H))
    w_hh_l1 = u(ks[5], (4 * H, H))
    b_ih_l1 = u(ks[6], (4 * H,))
    b_hh_l1 = u(ks[7], (4 * H,))

    # MHA with sequence length 1: only v_proj and out_proj affect the output
    # (attention weights are identically 1 over the single key, per head).
    w_v = u(ks[8], (H, H))
    b_v = u(ks[9], (H,))
    w_o = u(ks[10], (H, H))
    b_o = u(ks[11], (H,))

    w_fc1 = u(ks[12], (H, H))
    b_fc1 = u(ks[13], (H,))
    w_fc2 = u(ks[14], (action_dim, H))
    b_fc2 = u(ks[15], (action_dim,))

    # --- kernel-friendly (pre-transposed / pre-fused) parameters -------------
    w_ih1_t = w_ih_l0.T                          # (S, 4H)
    w_hh1_t = w_hh_l0.T                          # (H, 4H)
    w_ih2_t = w_ih_l1.T                          # (H, 4H)
    w_hh2_t = w_hh_l1.T                          # (H, 4H)
    wv_t, wo_t, wf1_t, wf2_t = w_v.T, w_o.T, w_fc1.T, w_fc2.T
    bv = b_v.reshape(1, H)
    bo = b_o.reshape(1, H)
    bf1 = b_fc1.reshape(1, H)

    # Folded head: fc1_pre = last @ W_head + b_head (seq-len-1 attention fold).
    w_head = wv_t @ wo_t @ wf1_t                 # (H, H)
    b_head = (bv @ wo_t + bo) @ wf1_t + bf1      # (1, H)

    return {
        "hidden_dim": H,
        "action_dim": action_dim,
        # kernel params
        "w_ih1_t": w_ih1_t, "w_hh1_t": w_hh1_t,
        "b1": (b_ih_l0 + b_hh_l0).reshape(1, 4 * H),
        "w_ih2_t": w_ih2_t, "w_hh2_t": w_hh2_t,
        "b2": (b_ih_l1 + b_hh_l1).reshape(1, 4 * H),
        "w_head": w_head, "b_head": b_head,
        "wf2_t": wf2_t, "bf2": b_fc2.reshape(1, action_dim),
        # original (unfused) params, kept for the pure-JAX reference check
        "wv_t": wv_t, "bv": bv, "wo_t": wo_t, "bo": bo,
        "wf1_t": wf1_t, "bf1": bf1,
    }


def _reference_forward(x, p):
    """Pure-JAX reference of the ORIGINAL (unfused, layer-by-layer) math."""
    B, T, S = x.shape
    H = p["hidden_dim"]
    h1 = c1 = h2 = c2 = jnp.zeros((B, H), jnp.float32)

    def gates_to_hc(g, c_prev):
        i = jax.nn.sigmoid(g[:, :H])
        f = jax.nn.sigmoid(g[:, H:2 * H])
        gg = jnp.tanh(g[:, 2 * H:3 * H])
        o = jax.nn.sigmoid(g[:, 3 * H:])
        c = f * c_prev + i * gg
        return o * jnp.tanh(c), c

    for t in range(T):
        x_t = x[:, t, :]
        h1, c1 = gates_to_hc(x_t @ p["w_ih1_t"] + h1 @ p["w_hh1_t"] + p["b1"], c1)
        h2, c2 = gates_to_hc(h1 @ p["w_ih2_t"] + h2 @ p["w_hh2_t"] + p["b2"], c2)

    # seq_len-1 self-attention == out_proj(v_proj(last))  (softmax over 1 key).
    v = h2 @ p["wv_t"] + p["bv"]
    attn = v @ p["wo_t"] + p["bo"]
    h = jnp.maximum(attn @ p["wf1_t"] + p["bf1"], 0.0)
    return h @ p["wf2_t"] + p["bf2"]


if __name__ == "__main__":
    B, T = 2, 8
    state_dim, action_dim, hidden_dim = 12, 6, 32

    key = jax.random.PRNGKey(0)
    k_x, k_p = jax.random.split(key)
    x = jax.random.normal(k_x, (B, T, state_dim), jnp.float32)
    params = init_params(k_p, state_dim, action_dim, hidden_dim)

    out = robot_arm_lstm_forward(x, params)
    out = jax.block_until_ready(out)

    ref = _reference_forward(x, params)
    assert out.shape == (B, action_dim)
    assert jnp.allclose(out, ref, atol=1e-4, rtol=1e-4)

    print("KERNEL_OK")
</pallas_src>

<mosaic_0001>
module attributes {stable_mosaic.version = 11 : i64} {
  func.func @_robot_arm_kernel(%arg0: i32, %arg1: memref<8x8x12xf32, #tpu.memory_space<vmem>>, %arg2: memref<12x128xf32, #tpu.memory_space<vmem>>, %arg3: memref<32x128xf32, #tpu.memory_space<vmem>>, %arg4: memref<1x128xf32, #tpu.memory_space<vmem>>, %arg5: memref<32x128xf32, #tpu.memory_space<vmem>>, %arg6: memref<32x128xf32, #tpu.memory_space<vmem>>, %arg7: memref<1x128xf32, #tpu.memory_space<vmem>>, %arg8: memref<32x32xf32, #tpu.memory_space<vmem>>, %arg9: memref<1x32xf32, #tpu.memory_space<vmem>>, %arg10: memref<32x6xf32, #tpu.memory_space<vmem>>, %arg11: memref<1x6xf32, #tpu.memory_space<vmem>>, %arg12: memref<8x6xf32, #tpu.memory_space<vmem>>) attributes {dimension_semantics = [#tpu.dimension_semantics<parallel>], iteration_bounds = array<i64: 1>, scalar_prefetch = 0 : i64, scratch_operands = 0 : i64, tpu.core_type = #tpu.core_type<tc>, window_params = [{transform_indices = @transform_0, window_bounds = array<i64: 8, 8, 12>}, {pipeline_mode = #tpu.pipeline_mode<synchronous>, transform_indices = @transform_1, window_bounds = array<i64: 12, 128>}, {pipeline_mode = #tpu.pipeline_mode<synchronous>, transform_indices = @transform_2, window_bounds = array<i64: 32, 128>}, {pipeline_mode = #tpu.pipeline_mode<synchronous>, transform_indices = @transform_3, window_bounds = array<i64: 1, 128>}, {pipeline_mode = #tpu.pipeline_mode<synchronous>, transform_indices = @transform_4, window_bounds = array<i64: 32, 128>}, {pipeline_mode = #tpu.pipeline_mode<synchronous>, transform_indices = @transform_5, window_bounds = array<i64: 32, 128>}, {pipeline_mode = #tpu.pipeline_mode<synchronous>, transform_indices = @transform_6, window_bounds = array<i64: 1, 128>}, {pipeline_mode = #tpu.pipeline_mode<synchronous>, transform_indices = @transform_7, window_bounds = array<i64: 32, 32>}, {pipeline_mode = #tpu.pipeline_mode<synchronous>, transform_indices = @transform_8, window_bounds = array<i64: 1, 32>}, {pipeline_mode = #tpu.pipeline_mode<synchronous>, transform_indices = @transform_9, window_bounds = array<i64: 32, 6>}, {pipeline_mode = #tpu.pipeline_mode<synchronous>, transform_indices = @transform_10, window_bounds = array<i64: 1, 6>}, {transform_indices = @transform_11, window_bounds = array<i64: 8, 6>}]} {
    %c0 = arith.constant 0 : index
    %c0_0 = arith.constant 0 : index
    %c0_1 = arith.constant 0 : index
    %0 = vector.load %arg1[%c0, %c0_0, %c0_1] : memref<8x8x12xf32, #tpu.memory_space<vmem>>, vector<8x8x12xf32>
    %1 = vector.shape_cast %0 : vector<8x8x12xf32> to vector<64x12xf32>
    %c0_2 = arith.constant 0 : index
    %c0_3 = arith.constant 0 : index
    %2 = vector.load %arg2[%c0_2, %c0_3] : memref<12x128xf32, #tpu.memory_space<vmem>>, vector<12x128xf32>
    %cst = arith.constant dense<0.000000e+00> : vector<64x128xf32>
    %3 = tpu.matmul %1, %2, %cst {dimension_numbers = #tpu.dot_dimension_numbers<[1], [0], [0], [1], [0, 0, 1, 1], [], []>} : vector<64x12xf32>, vector<12x128xf32>, vector<64x128xf32> -> vector<64x128xf32>
    %c0_4 = arith.constant 0 : index
    %c0_5 = arith.constant 0 : index
    %4 = vector.load %arg4[%c0_4, %c0_5] : memref<1x128xf32, #tpu.memory_space<vmem>>, vector<1x128xf32>
    %5 = vector.broadcast %4 : vector<1x128xf32> to vector<64x128xf32>
    %6 = arith.addf %3, %5 : vector<64x128xf32>
    %7 = vector.shape_cast %6 : vector<64x128xf32> to vector<8x8x128xf32>
    %c0_6 = arith.constant 0 : index
    %c0_7 = arith.constant 0 : index
    %8 = vector.load %arg3[%c0_6, %c0_7] : memref<32x128xf32, #tpu.memory_space<vmem>>, vector<32x128xf32>
    %c0_8 = arith.constant 0 : index
    %c0_9 = arith.constant 0 : index
    %9 = vector.load %arg5[%c0_8, %c0_9] : memref<32x128xf32, #tpu.memory_space<vmem>>, vector<32x128xf32>
    %c0_10 = arith.constant 0 : index
    %c0_11 = arith.constant 0 : index
    %10 = vector.load %arg6[%c0_10, %c0_11] : memref<32x128xf32, #tpu.memory_space<vmem>>, vector<32x128xf32>
    %c0_12 = arith.constant 0 : index
    %c0_13 = arith.constant 0 : index
    %11 = vector.load %arg7[%c0_12, %c0_13] : memref<1x128xf32, #tpu.memory_space<vmem>>, vector<1x128xf32>
    %12 = vector.shape_cast %11 : vector<1x128xf32> to vector<1x128xf32>
    %13 = vector.broadcast %12 : vector<1x128xf32> to vector<8x128xf32>
    %cst_14 = arith.constant 0.000000e+00 : f32
    %14 = vector.broadcast %cst_14 : f32 to vector<8x32xf32>
    %15 = vector.extract_strided_slice %7 {offsets = [0, 0, 0], sizes = [1, 8, 128], strides = [1, 1, 1]} : vector<8x8x128xf32> to vector<1x8x128xf32>
    %16 = vector.shape_cast %15 : vector<1x8x128xf32> to vector<8x128xf32>
    %cst_15 = arith.constant dense<0.000000e+00> : vector<8x128xf32>
    %17 = tpu.matmul %14, %8, %cst_15 {dimension_numbers = #tpu.dot_dimension_numbers<[1], [0], [0], [1], [0, 0, 1, 1], [], []>} : vector<8x32xf32>, vector<32x128xf32>, vector<8x128xf32> -> vector<8x128xf32>
    %18 = arith.addf %16, %17 : vector<8x128xf32>
    %19 = arith.negf %18 : vector<8x128xf32>
    %20 = math.exp %19 : vector<8x128xf32>
    %cst_16 = arith.constant 1.000000e+00 : f32
    %21 = vector.broadcast %cst_16 : f32 to vector<8x128xf32>
    %22 = arith.addf %21, %20 : vector<8x128xf32>
    %23 = arith.divf %21, %22 : vector<8x128xf32>
    %24 = math.tanh %18 : vector<8x128xf32>
    %25 = vector.extract_strided_slice %23 {offsets = [0, 0], sizes = [8, 32], strides = [1, 1]} : vector<8x128xf32> to vector<8x32xf32>
    %26 = vector.extract_strided_slice %23 {offsets = [0, 32], sizes = [8, 32], strides = [1, 1]} : vector<8x128xf32> to vector<8x32xf32>
    %27 = vector.extract_strided_slice %24 {offsets = [0, 64], sizes = [8, 32], strides = [1, 1]} : vector<8x128xf32> to vector<8x32xf32>
    %28 = vector.extract_strided_slice %23 {offsets = [0, 96], sizes = [8, 32], strides = [1, 1]} : vector<8x128xf32> to vector<8x32xf32>
    %29 = arith.mulf %26, %14 : vector<8x32xf32>
    %30 = arith.mulf %25, %27 : vector<8x32xf32>
    %31 = arith.addf %29, %30 : vector<8x32xf32>
    %32 = math.tanh %31 : vector<8x32xf32>
    %33 = arith.mulf %28, %32 : vector<8x32xf32>
    %cst_17 = arith.constant dense<0.000000e+00> : vector<8x128xf32>
    %34 = tpu.matmul %33, %9, %cst_17 {dimension_numbers = #tpu.dot_dimension_numbers<[1], [0], [0], [1], [0, 0, 1, 1], [], []>} : vector<8x32xf32>, vector<32x128xf32>, vector<8x128xf32> -> vector<8x128xf32>
    %cst_18 = arith.constant dense<0.000000e+00> : vector<8x128xf32>
    %35 = tpu.matmul %14, %10, %cst_18 {dimension_numbers = #tpu.dot_dimension_numbers<[1], [0], [0], [1], [0, 0, 1, 1], [], []>} : vector<8x32xf32>, vector<32x128xf32>, vector<8x128xf32> -> vector<8x128xf32>
    %36 = arith.addf %34, %35 : vector<8x128xf32>
    %37 = arith.addf %36, %13 : vector<8x128xf32>
    %38 = arith.negf %37 : vector<8x128xf32>
    %39 = math.exp %38 : vector<8x128xf32>
    %cst_19 = arith.constant 1.000000e+00 : f32
    %40 = vector.broadcast %cst_19 : f32 to vector<8x128xf32>
    %41 = arith.addf %40, %39 : vector<8x128xf32>
    %42 = arith.divf %40, %41 : vector<8x128xf32>
    %43 = math.tanh %37 : vector<8x128xf32>
    %44 = vector.extract_strided_slice %42 {offsets = [0, 0], sizes = [8, 32], strides = [1, 1]} : vector<8x128xf32> to vector<8x32xf32>
    %45 = vector.extract_strided_slice %42 {offsets = [0, 32], sizes = [8, 32], strides = [1, 1]} : vector<8x128xf32> to vector<8x32xf32>
    %46 = vector.extract_strided_slice %43 {offsets = [0, 64], sizes = [8, 32], strides = [1, 1]} : vector<8x128xf32> to vector<8x32xf32>
    %47 = vector.extract_strided_slice %42 {offsets = [0, 96], sizes = [8, 32], strides = [1, 1]} : vector<8x128xf32> to vector<8x32xf32>
    %48 = arith.mulf %45, %14 : vector<8x32xf32>
    %49 = arith.mulf %44, %46 : vector<8x32xf32>
    %50 = arith.addf %48, %49 : vector<8x32xf32>
    %51 = math.tanh %50 : vector<8x32xf32>
    %52 = arith.mulf %47, %51 : vector<8x32xf32>
    %53 = vector.extract_strided_slice %7 {offsets = [1, 0, 0], sizes = [1, 8, 128], strides = [1, 1, 1]} : vector<8x8x128xf32> to vector<1x8x128xf32>
    %54 = vector.shape_cast %53 : vector<1x8x128xf32> to vector<8x128xf32>
    %cst_20 = arith.constant dense<0.000000e+00> : vector<8x128xf32>
    %55 = tpu.matmul %33, %8, %cst_20 {dimension_numbers = #tpu.dot_dimension_numbers<[1], [0], [0], [1], [0, 0, 1, 1], [], []>} : vector<8x32xf32>, vector<32x128xf32>, vector<8x128xf32> -> vector<8x128xf32>
    %56 = arith.addf %54, %55 : vector<8x128xf32>
    %57 = arith.negf %56 : vector<8x128xf32>
    %58 = math.exp %57 : vector<8x128xf32>
    %cst_21 = arith.constant 1.000000e+00 : f32
    %59 = vector.broadcast %cst_21 : f32 to vector<8x128xf32>
    %60 = arith.addf %59, %58 : vector<8x128xf32>
    %61 = arith.divf %59, %60 : vector<8x128xf32>
    %62 = math.tanh %56 : vector<8x128xf32>
    %63 = vector.extract_strided_slice %61 {offsets = [0, 0], sizes = [8, 32], strides = [1, 1]} : vector<8x128xf32> to vector<8x32xf32>
    %64 = vector.extract_strided_slice %61 {offsets = [0, 32], sizes = [8, 32], strides = [1, 1]} : vector<8x128xf32> to vector<8x32xf32>
    %65 = vector.extract_strided_slice %62 {offsets = [0, 64], sizes = [8, 32], strides = [1, 1]} : vector<8x128xf32> to vector<8x32xf32>
    %66 = vector.extract_strided_slice %61 {offsets = [0, 96], sizes = [8, 32], strides = [1, 1]} : vector<8x128xf32> to vector<8x32xf32>
    %67 = arith.mulf %64, %31 : vector<8x32xf32>
    %68 = arith.mulf %63, %65 : vector<8x32xf32>
    %69 = arith.addf %67, %68 : vector<8x32xf32>
    %70 = math.tanh %69 : vector<8x32xf32>
    %71 = arith.mulf %66, %70 : vector<8x32xf32>
    %cst_22 = arith.constant dense<0.000000e+00> : vector<8x128xf32>
    %72 = tpu.matmul %71, %9, %cst_22 {dimension_numbers = #tpu.dot_dimension_numbers<[1], [0], [0], [1], [0, 0, 1, 1], [], []>} : vector<8x32xf32>, vector<32x128xf32>, vector<8x128xf32> -> vector<8x128xf32>
    %cst_23 = arith.constant dense<0.000000e+00> : vector<8x128xf32>
    %73 = tpu.matmul %52, %10, %cst_23 {dimension_numbers = #tpu.dot_dimension_numbers<[1], [0], [0], [1], [0, 0, 1, 1], [], []>} : vector<8x32xf32>, vector<32x128xf32>, vector<8x128xf32> -> vector<8x128xf32>
    %74 = arith.addf %72, %73 : vector<8x128xf32>
    %75 = arith.addf %74, %13 : vector<8x128xf32>
    %76 = arith.negf %75 : vector<8x128xf32>
    %77 = math.exp %76 : vector<8x128xf32>
    %cst_24 = arith.constant 1.000000e+00 : f32
    %78 = vector.broadcast %cst_24 : f32 to vector<8x128xf32>
    %79 = arith.addf %78, %77 : vector<8x128xf32>
    %80 = arith.divf %78, %79 : vector<8x128xf32>
    %81 = math.tanh %75 : vector<8x128xf32>
    %82 = vector.extract_strided_slice %80 {offsets = [0, 0], sizes = [8, 32], strides = [1, 1]} : vector<8x128xf32> to vector<8x32xf32>
    %83 = vector.extract_strided_slice %80 {offsets = [0, 32], sizes = [8, 32], strides = [1, 1]} : vector<8x128xf32> to vector<8x32xf32>
    %84 = vector.extract_strided_slice %81 {offsets = [0, 64], sizes = [8, 32], strides = [1, 1]} : vector<8x128xf32> to vector<8x32xf32>
    %85 = vector.extract_strided_slice %80 {offsets = [0, 96], sizes = [8, 32], strides = [1, 1]} : vector<8x128xf32> to vector<8x32xf32>
    %86 = arith.mulf %83, %50 : vector<8x32xf32>
    %87 = arith.mulf %82, %84 : vector<8x32xf32>
    %88 = arith.addf %86, %87 : vector<8x32xf32>
    %89 = math.tanh %88 : vector<8x32xf32>
    %90 = arith.mulf %85, %89 : vector<8x32xf32>
    %91 = vector.extract_strided_slice %7 {offsets = [2, 0, 0], sizes = [1, 8, 128], strides = [1, 1, 1]} : vector<8x8x128xf32> to vector<1x8x128xf32>
    %92 = vector.shape_cast %91 : vector<1x8x128xf32> to vector<8x128xf32>
    %cst_25 = arith.constant dense<0.000000e+00> : vector<8x128xf32>
    %93 = tpu.matmul %71, %8, %cst_25 {dimension_numbers = #tpu.dot_dimension_numbers<[1], [0], [0], [1], [0, 0, 1, 1], [], []>} : vector<8x32xf32>, vector<32x128xf32>, vector<8x128xf32> -> vector<8x128xf32>
    %94 = arith.addf %92, %93 : vector<8x128xf32>
    %95 = arith.negf %94 : vector<8x128xf32>
    %96 = math.exp %95 : vector<8x128xf32>
    %cst_26 = arith.constant 1.000000e+00 : f32
    %97 = vector.broadcast %cst_26 : f32 to vector<8x128xf32>
    %98 = arith.addf %97, %96 : vector<8x128xf32>
    %99 = arith.divf %97, %98 : vector<8x128xf32>
    %100 = math.tanh %94 : vector<8x128xf32>
    %101 = vector.extract_strided_slice %99 {offsets = [0, 0], sizes = [8, 32], strides = [1, 1]} : vector<8x128xf32> to vector<8x32xf32>
    %102 = vector.extract_strided_slice %99 {offsets = [0, 32], sizes = [8, 32], strides = [1, 1]} : vector<8x128xf32> to vector<8x32xf32>
    %103 = vector.extract_strided_slice %100 {offsets = [0, 64], sizes = [8, 32], strides = [1, 1]} : vector<8x128xf32> to vector<8x32xf32>
    %104 = vector.extract_strided_slice %99 {offsets = [0, 96], sizes = [8, 32], strides = [1, 1]} : vector<8x128xf32> to vector<8x32xf32>
    %105 = arith.mulf %102, %69 : vector<8x32xf32>
    %106 = arith.mulf %101, %103 : vector<8x32xf32>
    %107 = arith.addf %105, %106 : vector<8x32xf32>
    %108 = math.tanh %107 : vector<8x32xf32>
    %109 = arith.mulf %104, %108 : vector<8x32xf32>
    %cst_27 = arith.constant dense<0.000000e+00> : vector<8x128xf32>
    %110 = tpu.matmul %109, %9, %cst_27 {dimension_numbers = #tpu.dot_dimension_numbers<[1], [0], [0], [1], [0, 0, 1, 1], [], []>} : vector<8x32xf32>, vector<32x128xf32>, vector<8x128xf32> -> vector<8x128xf32>
    %cst_28 = arith.constant dense<0.000000e+00> : vector<8x128xf32>
    %111 = tpu.matmul %90, %10, %cst_28 {dimension_numbers = #tpu.dot_dimension_numbers<[1], [0], [0], [1], [0, 0, 1, 1], [], []>} : vector<8x32xf32>, vector<32x128xf32>, vector<8x128xf32> -> vector<8x128xf32>
    %112 = arith.addf %110, %111 : vector<8x128xf32>
    %113 = arith.addf %112, %13 : vector<8x128xf32>
    %114 = arith.negf %113 : vector<8x128xf32>
    %115 = math.exp %114 : vector<8x128xf32>
    %cst_29 = arith.constant 1.000000e+00 : f32
    %116 = vector.broadcast %cst_29 : f32 to vector<8x128xf32>
    %117 = arith.addf %116, %115 : vector<8x128xf32>
    %118 = arith.divf %116, %117 : vector<8x128xf32>
    %119 = math.tanh %113 : vector<8x128xf32>
    %120 = vector.extract_strided_slice %118 {offsets = [0, 0], sizes = [8, 32], strides = [1, 1]} : vector<8x128xf32> to vector<8x32xf32>
    %121 = vector.extract_strided_slice %118 {offsets = [0, 32], sizes = [8, 32], strides = [1, 1]} : vector<8x128xf32> to vector<8x32xf32>
    %122 = vector.extract_strided_slice %119 {offsets = [0, 64], sizes = [8, 32], strides = [1, 1]} : vector<8x128xf32> to vector<8x32xf32>
    %123 = vector.extract_strided_slice %118 {offsets = [0, 96], sizes = [8, 32], strides = [1, 1]} : vector<8x128xf32> to vector<8x32xf32>
    %124 = arith.mulf %121, %88 : vector<8x32xf32>
    %125 = arith.mulf %120, %122 : vector<8x32xf32>
    %126 = arith.addf %124, %125 : vector<8x32xf32>
    %127 = math.tanh %126 : vector<8x32xf32>
    %128 = arith.mulf %123, %127 : vector<8x32xf32>
    %129 = vector.extract_strided_slice %7 {offsets = [3, 0, 0], sizes = [1, 8, 128], strides = [1, 1, 1]} : vector<8x8x128xf32> to vector<1x8x128xf32>
    %130 = vector.shape_cast %129 : vector<1x8x128xf32> to vector<8x128xf32>
    %cst_30 = arith.constant dense<0.000000e+00> : vector<8x128xf32>
    %131 = tpu.matmul %109, %8, %cst_30 {dimension_numbers = #tpu.dot_dimension_numbers<[1], [0], [0], [1], [0, 0, 1, 1], [], []>} : vector<8x32xf32>, vector<32x128xf32>, vector<8x128xf32> -> vector<8x128xf32>
    %132 = arith.addf %130, %131 : vector<8x128xf32>
    %133 = arith.negf %132 : vector<8x128xf32>
    %134 = math.exp %133 : vector<8x128xf32>
    %cst_31 = arith.constant 1.000000e+00 : f32
    %135 = vector.broadcast %cst_31 : f32 to vector<8x128xf32>
    %136 = arith.addf %135, %134 : vector<8x128xf32>
    %137 = arith.divf %135, %136 : vector<8x128xf32>
    %138 = math.tanh %132 : vector<8x128xf32>
    %139 = vector.extract_strided_slice %137 {offsets = [0, 0], sizes = [8, 32], strides = [1, 1]} : vector<8x128xf32> to vector<8x32xf32>
    %140 = vector.extract_strided_slice %137 {offsets = [0, 32], sizes = [8, 32], strides = [1, 1]} : vector<8x128xf32> to vector<8x32xf32>
    %141 = vector.extract_strided_slice %138 {offsets = [0, 64], sizes = [8, 32], strides = [1, 1]} : vector<8x128xf32> to vector<8x32xf32>
    %142 = vector.extract_strided_slice %137 {offsets = [0, 96], sizes = [8, 32], strides = [1, 1]} : vector<8x128xf32> to vector<8x32xf32>
    %143 = arith.mulf %140, %107 : vector<8x32xf32>
    %144 = arith.mulf %139, %141 : vector<8x32xf32>
    %145 = arith.addf %143, %144 : vector<8x32xf32>
    %146 = math.tanh %145 : vector<8x32xf32>
    %147 = arith.mulf %142, %146 : vector<8x32xf32>
    %cst_32 = arith.constant dense<0.000000e+00> : vector<8x128xf32>
    %148 = tpu.matmul %147, %9, %cst_32 {dimension_numbers = #tpu.dot_dimension_numbers<[1], [0], [0], [1], [0, 0, 1, 1], [], []>} : vector<8x32xf32>, vector<32x128xf32>, vector<8x128xf32> -> vector<8x128xf32>
    %cst_33 = arith.constant dense<0.000000e+00> : vector<8x128xf32>
    %149 = tpu.matmul %128, %10, %cst_33 {dimension_numbers = #tpu.dot_dimension_numbers<[1], [0], [0], [1], [0, 0, 1, 1], [], []>} : vector<8x32xf32>, vector<32x128xf32>, vector<8x128xf32> -> vector<8x128xf32>
    %150 = arith.addf %148, %149 : vector<8x128xf32>
    %151 = arith.addf %150, %13 : vector<8x128xf32>
    %152 = arith.negf %151 : vector<8x128xf32>
    %153 = math.exp %152 : vector<8x128xf32>
    %cst_34 = arith.constant 1.000000e+00 : f32
    %154 = vector.broadcast %cst_34 : f32 to vector<8x128xf32>
    %155 = arith.addf %154, %153 : vector<8x128xf32>
    %156 = arith.divf %154, %155 : vector<8x128xf32>
    %157 = math.tanh %151 : vector<8x128xf32>
    %158 = vector.extract_strided_slice %156 {offsets = [0, 0], sizes = [8, 32], strides = [1, 1]} : vector<8x128xf32> to vector<8x32xf32>
    %159 = vector.extract_strided_slice %156 {offsets = [0, 32], sizes = [8, 32], strides = [1, 1]} : vector<8x128xf32> to vector<8x32xf32>
    %160 = vector.extract_strided_slice %157 {offsets = [0, 64], sizes = [8, 32], strides = [1, 1]} : vector<8x128xf32> to vector<8x32xf32>
    %161 = vector.extract_strided_slice %156 {offsets = [0, 96], sizes = [8, 32], strides = [1, 1]} : vector<8x128xf32> to vector<8x32xf32>
    %162 = arith.mulf %159, %126 : vector<8x32xf32>
    %163 = arith.mulf %158, %160 : vector<8x32xf32>
    %164 = arith.addf %162, %163 : vector<8x32xf32>
    %165 = math.tanh %164 : vector<8x32xf32>
    %166 = arith.mulf %161, %165 : vector<8x32xf32>
    %167 = vector.extract_strided_slice %7 {offsets = [4, 0, 0], sizes = [1, 8, 128], strides = [1, 1, 1]} : vector<8x8x128xf32> to vector<1x8x128xf32>
    %168 = vector.shape_cast %167 : vector<1x8x128xf32> to vector<8x128xf32>
    %cst_35 = arith.constant dense<0.000000e+00> : vector<8x128xf32>
    %169 = tpu.matmul %147, %8, %cst_35 {dimension_numbers = #tpu.dot_dimension_numbers<[1], [0], [0], [1], [0, 0, 1, 1], [], []>} : vector<8x32xf32>, vector<32x128xf32>, vector<8x128xf32> -> vector<8x128xf32>
    %170 = arith.addf %168, %169 : vector<8x128xf32>
    %171 = arith.negf %170 : vector<8x128xf32>
    %172 = math.exp %171 : vector<8x128xf32>
    %cst_36 = arith.constant 1.000000e+00 : f32
    %173 = vector.broadcast %cst_36 : f32 to vector<8x128xf32>
    %174 = arith.addf %173, %172 : vector<8x128xf32>
    %175 = arith.divf %173, %174 : vector<8x128xf32>
    %176 = math.tanh %170 : vector<8x128xf32>
    %177 = vector.extract_strided_slice %175 {offsets = [0, 0], sizes = [8, 32], strides = [1, 1]} : vector<8x128xf32> to vector<8x32xf32>
    %178 = vector.extract_strided_slice %175 {offsets = [0, 32], sizes = [8, 32], strides = [1, 1]} : vector<8x128xf32> to vector<8x32xf32>
    %179 = vector.extract_strided_slice %176 {offsets = [0, 64], sizes = [8, 32], strides = [1, 1]} : vector<8x128xf32> to vector<8x32xf32>
    %180 = vector.extract_strided_slice %175 {offsets = [0, 96], sizes = [8, 32], strides = [1, 1]} : vector<8x128xf32> to vector<8x32xf32>
    %181 = arith.mulf %178, %145 : vector<8x32xf32>
    %182 = arith.mulf %177, %179 : vector<8x32xf32>
    %183 = arith.addf %181, %182 : vector<8x32xf32>
    %184 = math.tanh %183 : vector<8x32xf32>
    %185 = arith.mulf %180, %184 : vector<8x32xf32>
    %cst_37 = arith.constant dense<0.000000e+00> : vector<8x128xf32>
    %186 = tpu.matmul %185, %9, %cst_37 {dimension_numbers = #tpu.dot_dimension_numbers<[1], [0], [0], [1], [0, 0, 1, 1], [], []>} : vector<8x32xf32>, vector<32x128xf32>, vector<8x128xf32> -> vector<8x128xf32>
    %cst_38 = arith.constant dense<0.000000e+00> : vector<8x128xf32>
    %187 = tpu.matmul %166, %10, %cst_38 {dimension_numbers = #tpu.dot_dimension_numbers<[1], [0], [0], [1], [0, 0, 1, 1], [], []>} : vector<8x32xf32>, vector<32x128xf32>, vector<8x128xf32> -> vector<8x128xf32>
    %188 = arith.addf %186, %187 : vector<8x128xf32>
    %189 = arith.addf %188, %13 : vector<8x128xf32>
    %190 = arith.negf %189 : vector<8x128xf32>
    %191 = math.exp %190 : vector<8x128xf32>
    %cst_39 = arith.constant 1.000000e+00 : f32
    %192 = vector.broadcast %cst_39 : f32 to vector<8x128xf32>
    %193 = arith.addf %192, %191 : vector<8x128xf32>
    %194 = arith.divf %192, %193 : vector<8x128xf32>
    %195 = math.tanh %189 : vector<8x128xf32>
    %196 = vector.extract_strided_slice %194 {offsets = [0, 0], sizes = [8, 32], strides = [1, 1]} : vector<8x128xf32> to vector<8x32xf32>
    %197 = vector.extract_strided_slice %194 {offsets = [0, 32], sizes = [8, 32], strides = [1, 1]} : vector<8x128xf32> to vector<8x32xf32>
    %198 = vector.extract_strided_slice %195 {offsets = [0, 64], sizes = [8, 32], strides = [1, 1]} : vector<8x128xf32> to vector<8x32xf32>
    %199 = vector.extract_strided_slice %194 {offsets = [0, 96], sizes = [8, 32], strides = [1, 1]} : vector<8x128xf32> to vector<8x32xf32>
    %200 = arith.mulf %197, %164 : vector<8x32xf32>
    %201 = arith.mulf %196, %198 : vector<8x32xf32>
    %202 = arith.addf %200, %201 : vector<8x32xf32>
    %203 = math.tanh %202 : vector<8x32xf32>
    %204 = arith.mulf %199, %203 : vector<8x32xf32>
    %205 = vector.extract_strided_slice %7 {offsets = [5, 0, 0], sizes = [1, 8, 128], strides = [1, 1, 1]} : vector<8x8x128xf32> to vector<1x8x128xf32>
    %206 = vector.shape_cast %205 : vector<1x8x128xf32> to vector<8x128xf32>
    %cst_40 = arith.constant dense<0.000000e+00> : vector<8x128xf32>
    %207 = tpu.matmul %185, %8, %cst_40 {dimension_numbers = #tpu.dot_dimension_numbers<[1], [0], [0], [1], [0, 0, 1, 1], [], []>} : vector<8x32xf32>, vector<32x128xf32>, vector<8x128xf32> -> vector<8x128xf32>
    %208 = arith.addf %206, %207 : vector<8x128xf32>
    %209 = arith.negf %208 : vector<8x128xf32>
    %210 = math.exp %209 : vector<8x128xf32>
    %cst_41 = arith.constant 1.000000e+00 : f32
    %211 = vector.broadcast %cst_41 : f32 to vector<8x128xf32>
    %212 = arith.addf %211, %210 : vector<8x128xf32>
    %213 = arith.divf %211, %212 : vector<8x128xf32>
    %214 = math.tanh %208 : vector<8x128xf32>
    %215 = vector.extract_strided_slice %213 {offsets = [0, 0], sizes = [8, 32], strides = [1, 1]} : vector<8x128xf32> to vector<8x32xf32>
    %216 = vector.extract_strided_slice %213 {offsets = [0, 32], sizes = [8, 32], strides = [1, 1]} : vector<8x128xf32> to vector<8x32xf32>
    %217 = vector.extract_strided_slice %214 {offsets = [0, 64], sizes = [8, 32], strides = [1, 1]} : vector<8x128xf32> to vector<8x32xf32>
    %218 = vector.extract_strided_slice %213 {offsets = [0, 96], sizes = [8, 32], strides = [1, 1]} : vector<8x128xf32> to vector<8x32xf32>
    %219 = arith.mulf %216, %183 : vector<8x32xf32>
    %220 = arith.mulf %215, %217 : vector<8x32xf32>
    %221 = arith.addf %219, %220 : vector<8x32xf32>
    %222 = math.tanh %221 : vector<8x32xf32>
    %223 = arith.mulf %218, %222 : vector<8x32xf32>
    %cst_42 = arith.constant dense<0.000000e+00> : vector<8x128xf32>
    %224 = tpu.matmul %223, %9, %cst_42 {dimension_numbers = #tpu.dot_dimension_numbers<[1], [0], [0], [1], [0, 0, 1, 1], [], []>} : vector<8x32xf32>, vector<32x128xf32>, vector<8x128xf32> -> vector<8x128xf32>
    %cst_43 = arith.constant dense<0.000000e+00> : vector<8x128xf32>
    %225 = tpu.matmul %204, %10, %cst_43 {dimension_numbers = #tpu.dot_dimension_numbers<[1], [0], [0], [1], [0, 0, 1, 1], [], []>} : vector<8x32xf32>, vector<32x128xf32>, vector<8x128xf32> -> vector<8x128xf32>
    %226 = arith.addf %224, %225 : vector<8x128xf32>
    %227 = arith.addf %226, %13 : vector<8x128xf32>
    %228 = arith.negf %227 : vector<8x128xf32>
    %229 = math.exp %228 : vector<8x128xf32>
    %cst_44 = arith.constant 1.000000e+00 : f32
    %230 = vector.broadcast %cst_44 : f32 to vector<8x128xf32>
    %231 = arith.addf %230, %229 : vector<8x128xf32>
    %232 = arith.divf %230, %231 : vector<8x128xf32>
    %233 = math.tanh %227 : vector<8x128xf32>
    %234 = vector.extract_strided_slice %232 {offsets = [0, 0], sizes = [8, 32], strides = [1, 1]} : vector<8x128xf32> to vector<8x32xf32>
    %235 = vector.extract_strided_slice %232 {offsets = [0, 32], sizes = [8, 32], strides = [1, 1]} : vector<8x128xf32> to vector<8x32xf32>
    %236 = vector.extract_strided_slice %233 {offsets = [0, 64], sizes = [8, 32], strides = [1, 1]} : vector<8x128xf32> to vector<8x32xf32>
    %237 = vector.extract_strided_slice %232 {offsets = [0, 96], sizes = [8, 32], strides = [1, 1]} : vector<8x128xf32> to vector<8x32xf32>
    %238 = arith.mulf %235, %202 : vector<8x32xf32>
    %239 = arith.mulf %234, %236 : vector<8x32xf32>
    %240 = arith.addf %238, %239 : vector<8x32xf32>
    %241 = math.tanh %240 : vector<8x32xf32>
    %242 = arith.mulf %237, %241 : vector<8x32xf32>
    %243 = vector.extract_strided_slice %7 {offsets = [6, 0, 0], sizes = [1, 8, 128], strides = [1, 1, 1]} : vector<8x8x128xf32> to vector<1x8x128xf32>
    %244 = vector.shape_cast %243 : vector<1x8x128xf32> to vector<8x128xf32>
    %cst_45 = arith.constant dense<0.000000e+00> : vector<8x128xf32>
    %245 = tpu.matmul %223, %8, %cst_45 {dimension_numbers = #tpu.dot_dimension_numbers<[1], [0], [0], [1], [0, 0, 1, 1], [], []>} : vector<8x32xf32>, vector<32x128xf32>, vector<8x128xf32> -> vector<8x128xf32>
    %246 = arith.addf %244, %245 : vector<8x128xf32>
    %247 = arith.negf %246 : vector<8x128xf32>
    %248 = math.exp %247 : vector<8x128xf32>
    %cst_46 = arith.constant 1.000000e+00 : f32
    %249 = vector.broadcast %cst_46 : f32 to vector<8x128xf32>
    %250 = arith.addf %249, %248 : vector<8x128xf32>
    %251 = arith.divf %249, %250 : vector<8x128xf32>
    %252 = math.tanh %246 : vector<8x128xf32>
    %253 = vector.extract_strided_slice %251 {offsets = [0, 0], sizes = [8, 32], strides = [1, 1]} : vector<8x128xf32> to vector<8x32xf32>
    %254 = vector.extract_strided_slice %251 {offsets = [0, 32], sizes = [8, 32], strides = [1, 1]} : vector<8x128xf32> to vector<8x32xf32>
    %255 = vector.extract_strided_slice %252 {offsets = [0, 64], sizes = [8, 32], strides = [1, 1]} : vector<8x128xf32> to vector<8x32xf32>
    %256 = vector.extract_strided_slice %251 {offsets = [0, 96], sizes = [8, 32], strides = [1, 1]} : vector<8x128xf32> to vector<8x32xf32>
    %257 = arith.mulf %254, %221 : vector<8x32xf32>
    %258 = arith.mulf %253, %255 : vector<8x32xf32>
    %259 = arith.addf %257, %258 : vector<8x32xf32>
    %260 = math.tanh %259 : vector<8x32xf32>
    %261 = arith.mulf %256, %260 : vector<8x32xf32>
    %cst_47 = arith.constant dense<0.000000e+00> : vector<8x128xf32>
    %262 = tpu.matmul %261, %9, %cst_47 {dimension_numbers = #tpu.dot_dimension_numbers<[1], [0], [0], [1], [0, 0, 1, 1], [], []>} : vector<8x32xf32>, vector<32x128xf32>, vector<8x128xf32> -> vector<8x128xf32>
    %cst_48 = arith.constant dense<0.000000e+00> : vector<8x128xf32>
    %263 = tpu.matmul %242, %10, %cst_48 {dimension_numbers = #tpu.dot_dimension_numbers<[1], [0], [0], [1], [0, 0, 1, 1], [], []>} : vector<8x32xf32>, vector<32x128xf32>, vector<8x128xf32> -> vector<8x128xf32>
    %264 = arith.addf %262, %263 : vector<8x128xf32>
    %265 = arith.addf %264, %13 : vector<8x128xf32>
    %266 = arith.negf %265 : vector<8x128xf32>
    %267 = math.exp %266 : vector<8x128xf32>
    %cst_49 = arith.constant 1.000000e+00 : f32
    %268 = vector.broadcast %cst_49 : f32 to vector<8x128xf32>
    %269 = arith.addf %268, %267 : vector<8x128xf32>
    %270 = arith.divf %268, %269 : vector<8x128xf32>
    %271 = math.tanh %265 : vector<8x128xf32>
    %272 = vector.extract_strided_slice %270 {offsets = [0, 0], sizes = [8, 32], strides = [1, 1]} : vector<8x128xf32> to vector<8x32xf32>
    %273 = vector.extract_strided_slice %270 {offsets = [0, 32], sizes = [8, 32], strides = [1, 1]} : vector<8x128xf32> to vector<8x32xf32>
    %274 = vector.extract_strided_slice %271 {offsets = [0, 64], sizes = [8, 32], strides = [1, 1]} : vector<8x128xf32> to vector<8x32xf32>
    %275 = vector.extract_strided_slice %270 {offsets = [0, 96], sizes = [8, 32], strides = [1, 1]} : vector<8x128xf32> to vector<8x32xf32>
    %276 = arith.mulf %273, %240 : vector<8x32xf32>
    %277 = arith.mulf %272, %274 : vector<8x32xf32>
    %278 = arith.addf %276, %277 : vector<8x32xf32>
    %279 = math.tanh %278 : vector<8x32xf32>
    %280 = arith.mulf %275, %279 : vector<8x32xf32>
    %281 = vector.extract_strided_slice %7 {offsets = [7, 0, 0], sizes = [1, 8, 128], strides = [1, 1, 1]} : vector<8x8x128xf32> to vector<1x8x128xf32>
    %282 = vector.shape_cast %281 : vector<1x8x128xf32> to vector<8x128xf32>
    %cst_50 = arith.constant dense<0.000000e+00> : vector<8x128xf32>
    %283 = tpu.matmul %261, %8, %cst_50 {dimension_numbers = #tpu.dot_dimension_numbers<[1], [0], [0], [1], [0, 0, 1, 1], [], []>} : vector<8x32xf32>, vector<32x128xf32>, vector<8x128xf32> -> vector<8x128xf32>
    %284 = arith.addf %282, %283 : vector<8x128xf32>
    %285 = arith.negf %284 : vector<8x128xf32>
    %286 = math.exp %285 : vector<8x128xf32>
    %cst_51 = arith.constant 1.000000e+00 : f32
    %287 = vector.broadcast %cst_51 : f32 to vector<8x128xf32>
    %288 = arith.addf %287, %286 : vector<8x128xf32>
    %289 = arith.divf %287, %288 : vector<8x128xf32>
    %290 = math.tanh %284 : vector<8x128xf32>
    %291 = vector.extract_strided_slice %289 {offsets = [0, 0], sizes = [8, 32], strides = [1, 1]} : vector<8x128xf32> to vector<8x32xf32>
    %292 = vector.extract_strided_slice %289 {offsets = [0, 32], sizes = [8, 32], strides = [1, 1]} : vector<8x128xf32> to vector<8x32xf32>
    %293 = vector.extract_strided_slice %290 {offsets = [0, 64], sizes = [8, 32], strides = [1, 1]} : vector<8x128xf32> to vector<8x32xf32>
    %294 = vector.extract_strided_slice %289 {offsets = [0, 96], sizes = [8, 32], strides = [1, 1]} : vector<8x128xf32> to vector<8x32xf32>
    %295 = arith.mulf %292, %259 : vector<8x32xf32>
    %296 = arith.mulf %291, %293 : vector<8x32xf32>
    %297 = arith.addf %295, %296 : vector<8x32xf32>
    %298 = math.tanh %297 : vector<8x32xf32>
    %299 = arith.mulf %294, %298 : vector<8x32xf32>
    %cst_52 = arith.constant dense<0.000000e+00> : vector<8x128xf32>
    %300 = tpu.matmul %299, %9, %cst_52 {dimension_numbers = #tpu.dot_dimension_numbers<[1], [0], [0], [1], [0, 0, 1, 1], [], []>} : vector<8x32xf32>, vector<32x128xf32>, vector<8x128xf32> -> vector<8x128xf32>
    %cst_53 = arith.constant dense<0.000000e+00> : vector<8x128xf32>
    %301 = tpu.matmul %280, %10, %cst_53 {dimension_numbers = #tpu.dot_dimension_numbers<[1], [0], [0], [1], [0, 0, 1, 1], [], []>} : vector<8x32xf32>, vector<32x128xf32>, vector<8x128xf32> -> vector<8x128xf32>
    %302 = arith.addf %300, %301 : vector<8x128xf32>
    %303 = arith.addf %302, %13 : vector<8x128xf32>
    %304 = arith.negf %303 : vector<8x128xf32>
    %305 = math.exp %304 : vector<8x128xf32>
    %cst_54 = arith.constant 1.000000e+00 : f32
    %306 = vector.broadcast %cst_54 : f32 to vector<8x128xf32>
    %307 = arith.addf %306, %305 : vector<8x128xf32>
    %308 = arith.divf %306, %307 : vector<8x128xf32>
    %309 = math.tanh %303 : vector<8x128xf32>
    %310 = vector.extract_strided_slice %308 {offsets = [0, 0], sizes = [8, 32], strides = [1, 1]} : vector<8x128xf32> to vector<8x32xf32>
    %311 = vector.extract_strided_slice %308 {offsets = [0, 32], sizes = [8, 32], strides = [1, 1]} : vector<8x128xf32> to vector<8x32xf32>
    %312 = vector.extract_strided_slice %309 {offsets = [0, 64], sizes = [8, 32], strides = [1, 1]} : vector<8x128xf32> to vector<8x32xf32>
    %313 = vector.extract_strided_slice %308 {offsets = [0, 96], sizes = [8, 32], strides = [1, 1]} : vector<8x128xf32> to vector<8x32xf32>
    %314 = arith.mulf %311, %278 : vector<8x32xf32>
    %315 = arith.mulf %310, %312 : vector<8x32xf32>
    %316 = arith.addf %314, %315 : vector<8x32xf32>
    %317 = math.tanh %316 : vector<8x32xf32>
    %318 = arith.mulf %313, %317 : vector<8x32xf32>
    %c0_55 = arith.constant 0 : index
    %c0_56 = arith.constant 0 : index
    %319 = vector.load %arg8[%c0_55, %c0_56] : memref<32x32xf32, #tpu.memory_space<vmem>>, vector<32x32xf32>
    %cst_57 = arith.constant dense<0.000000e+00> : vector<8x32xf32>
    %320 = tpu.matmul %318, %319, %cst_57 {dimension_numbers = #tpu.dot_dimension_numbers<[1], [0], [0], [1], [0, 0, 1, 1], [], []>} : vector<8x32xf32>, vector<32x32xf32>, vector<8x32xf32> -> vector<8x32xf32>
    %c0_58 = arith.constant 0 : index
    %c0_59 = arith.constant 0 : index
    %321 = vector.load %arg9[%c0_58, %c0_59] : memref<1x32xf32, #tpu.memory_space<vmem>>, vector<1x32xf32>
    %322 = vector.broadcast %321 : vector<1x32xf32> to vector<8x32xf32>
    %323 = arith.addf %320, %322 : vector<8x32xf32>
    %cst_60 = arith.constant 0.000000e+00 : f32
    %324 = vector.broadcast %cst_60 : f32 to vector<8x32xf32>
    %325 = arith.maximumf %323, %324 : vector<8x32xf32>
    %c0_61 = arith.constant 0 : index
    %c0_62 = arith.constant 0 : index
    %326 = vector.load %arg10[%c0_61, %c0_62] : memref<32x6xf32, #tpu.memory_space<vmem>>, vector<32x6xf32>
    %cst_63 = arith.constant dense<0.000000e+00> : vector<8x6xf32>
    %327 = tpu.matmul %325, %326, %cst_63 {dimension_numbers = #tpu.dot_dimension_numbers<[1], [0], [0], [1], [0, 0, 1, 1], [], []>} : vector<8x32xf32>, vector<32x6xf32>, vector<8x6xf32> -> vector<8x6xf32>
    %c0_64 = arith.constant 0 : index
    %c0_65 = arith.constant 0 : index
    %328 = vector.load %arg11[%c0_64, %c0_65] : memref<1x6xf32, #tpu.memory_space<vmem>>, vector<1x6xf32>
    %329 = vector.broadcast %328 : vector<1x6xf32> to vector<8x6xf32>
    %330 = arith.addf %327, %329 : vector<8x6xf32>
    %c0_66 = arith.constant 0 : index
    %c0_67 = arith.constant 0 : index
    %331 = vector.load %arg12[%c0_66, %c0_67] : memref<8x6xf32, #tpu.memory_space<vmem>>, vector<8x6xf32>
    tpu.vector_store %arg12[%c0_66, %c0_67], %330 {strides = array<i32>} : memref<8x6xf32, #tpu.memory_space<vmem>>, vector<8x6xf32>,
    return
  }
  func.func @transform_0(%arg0: i32) -> (i32, i32, i32) {
    %c0_i32 = arith.constant 0 : i32
    %c0_i32_0 = arith.constant 0 : i32
    %c0_i32_1 = arith.constant 0 : i32
    return %c0_i32, %arg0, %c0_i32_0 : i32, i32, i32
  }
  func.func @transform_1(%arg0: i32) -> (i32, i32) {
    %c0_i32 = arith.constant 0 : i32
    %c0_i32_0 = arith.constant 0 : i32
    %c0_i32_1 = arith.constant 0 : i32
    return %c0_i32, %c0_i32_0 : i32, i32
  }
  func.func @transform_2(%arg0: i32) -> (i32, i32) {
    %c0_i32 = arith.constant 0 : i32
    %c0_i32_0 = arith.constant 0 : i32
    %c0_i32_1 = arith.constant 0 : i32
    return %c0_i32, %c0_i32_0 : i32, i32
  }
  func.func @transform_3(%arg0: i32) -> (i32, i32) {
    %c0_i32 = arith.constant 0 : i32
    %c0_i32_0 = arith.constant 0 : i32
    %c0_i32_1 = arith.constant 0 : i32
    return %c0_i32, %c0_i32_0 : i32, i32
  }
  func.func @transform_4(%arg0: i32) -> (i32, i32) {
    %c0_i32 = arith.constant 0 : i32
    %c0_i32_0 = arith.constant 0 : i32
    %c0_i32_1 = arith.constant 0 : i32
    return %c0_i32, %c0_i32_0 : i32, i32
  }
  func.func @transform_5(%arg0: i32) -> (i32, i32) {
    %c0_i32 = arith.constant 0 : i32
    %c0_i32_0 = arith.constant 0 : i32
    %c0_i32_1 = arith.constant 0 : i32
    return %c0_i32, %c0_i32_0 : i32, i32
  }
  func.func @transform_6(%arg0: i32) -> (i32, i32) {
    %c0_i32 = arith.constant 0 : i32
    %c0_i32_0 = arith.constant 0 : i32
    %c0_i32_1 = arith.constant 0 : i32
    return %c0_i32, %c0_i32_0 : i32, i32
  }
  func.func @transform_7(%arg0: i32) -> (i32, i32) {
    %c0_i32 = arith.constant 0 : i32
    %c0_i32_0 = arith.constant 0 : i32
    %c0_i32_1 = arith.constant 0 : i32
    return %c0_i32, %c0_i32_0 : i32, i32
  }
  func.func @transform_8(%arg0: i32) -> (i32, i32) {
    %c0_i32 = arith.constant 0 : i32
    %c0_i32_0 = arith.constant 0 : i32
    %c0_i32_1 = arith.constant 0 : i32
    return %c0_i32, %c0_i32_0 : i32, i32
  }
  func.func @transform_9(%arg0: i32) -> (i32, i32) {
    %c0_i32 = arith.constant 0 : i32
    %c0_i32_0 = arith.constant 0 : i32
    %c0_i32_1 = arith.constant 0 : i32
    return %c0_i32, %c0_i32_0 : i32, i32
  }
  func.func @transform_10(%arg0: i32) -> (i32, i32) {
    %c0_i32 = arith.constant 0 : i32
    %c0_i32_0 = arith.constant 0 : i32
    %c0_i32_1 = arith.constant 0 : i32
    return %c0_i32, %c0_i32_0 : i32, i32
  }
  func.func @transform_11(%arg0: i32) -> (i32, i32) {
    %c0_i32 = arith.constant 0 : i32
    %c0_i32_0 = arith.constant 0 : i32
    return %arg0, %c0_i32 : i32, i32
  }
}

</mosaic_0001>

<bundles_post_ra>
// kernel: tpu_custom_call.1
= control target key start
LH: loop header
LB: loop body
LE: loop exit
PB: predicated region body
PF: predicated region fallthrough
CT: control target
= control target key end

     0   :  { %16 = vsyncpa [#allocation3], 0  ;;  %s2241_s0 = inlined_call_operand.hbm [shape: f32[8,8,12], index: 0, kind: input, shape index: {}]   ;;  %s2242_s1 = inlined_call_operand.hbm [shape: f32[12,128], index: 1, kind: input, shape index: {}]   ;;  %s2243_s2 = inlined_call_operand.vmem [shape: f32[32,128], index: 2, kind: input, shape index: {}]   ;;  %s2244_s3 = inlined_call_operand.vmem [shape: f32[1,128], index: 3, kind: input, shape index: {}]   ;;  %s2245_s4 = inlined_call_operand.hbm [shape: f32[32,128], index: 4, kind: input, shape index: {}]   ;;  %s2246_s5 = inlined_call_operand.hbm [shape: f32[32,128], index: 5, kind: input, shape index: {}]   ;;  %s2247_s6 = inlined_call_operand.vmem [shape: f32[1,128], index: 6, kind: input, shape index: {}]   ;;  %s2248_s7 = inlined_call_operand.hbm [shape: f32[32,32], index: 7, kind: input, shape index: {}]   ;;  %s2249_s8 = inlined_call_operand.vmem [shape: f32[1,32], index: 8, kind: input, shape index: {}]   ;;  %s2250_s9 = inlined_call_operand.vmem [shape: f32[32,6], index: 9, kind: input, shape index: {}]   ;;  %s2251_s10 = inlined_call_operand.vmem [shape: f32[1,6], index: 10, kind: input, shape index: {}]   ;;  %s2252_s11 = inlined_call_operand.hbm [shape: f32[8,6], index: 11, kind: output, shape index: {}]  }
   0x1   :  { %17 = vsyncpa [#allocation6], 0 }
   0x2   :  { %18 = vsyncpa [#allocation9], 0 }
   0x3   :  { %19 = vsyncpa [#allocation4], 0  ;;  %s37_s19 = sshll.u32 %s2242_s1, 4  ;;  %s1818_s20 = smov [#allocation5]   ;;  %s38_s19 = int_to_ptr.hbm [resolvable:$true] %s37_s19 }
   0x4   :  { %s39_s21 = sshll.u32 %s1818_s20, 4  ;;  %s67_s24 = sshll.u32 %s2246_s5, 4  ;;  %s40_s21 = int_to_ptr.vmem [resolvable:$true] %s39_s21  ;;  %s68_s24 = int_to_ptr.hbm [resolvable:$true] %s67_s24 }
   0x5   :  { %s1819_s25 = smov 128   ;;  %s1820_s26 = smov 8  }
   0x6   :  { %45 = dma.hbm_to_vmem [thread:$0]  %s38_s19, 256, %s40_s21, [#allocation6], %s1819_s25, %s1819_s25, %s1820_s26  }
   0x7   :  { %s1821_s27 = smov [#allocation8]   ;;  %s24_s12 = sshll.u32 %s2241_s0, 4  ;;  %s25_s12 = int_to_ptr.hbm [resolvable:$true] %s24_s12 }
   0x8   :  { %s69_s28 = sshll.u32 %s1821_s27, 4  ;;  %s54_s14 = sshll.u32 %s2245_s4, 4  ;;  %s70_s28 = int_to_ptr.vmem [resolvable:$true] %s69_s28  ;;  %s55_s14 = int_to_ptr.hbm [resolvable:$true] %s54_s14 }
   0x9   :  { %75 = dma.hbm_to_vmem [thread:$0]  %s68_s24, 512, %s70_s28, [#allocation9], %s1819_s25, %s1819_s25, %s1820_s26  }
   0xa   :  { %s1822_s15 = smov [#allocation2]   ;;  %s1823_s5 = smov [#allocation7]  }
   0xb   :  { %s26_s16 = sshll.u32 %s1822_s15, 4  ;;  %s56_s17 = sshll.u32 %s1823_s5, 4  ;;  %s27_s16 = int_to_ptr.vmem [resolvable:$true] %s26_s16  ;;  %s57_s17 = int_to_ptr.vmem [resolvable:$true] %s56_s17 }
   0xc   :  { %32 = dma.hbm_to_vmem [thread:$0]  %s25_s12, 1024, %s27_s16, [#allocation3], %s1819_s25, %s1819_s25, %s1820_s26  }
   0xd   :  { %s82_s20 = sshll.u32 %s2248_s7, 4  ;;  %s1824_s0 = smov [#allocation10]   ;;  %s83_s20 = int_to_ptr.hbm [resolvable:$true] %s82_s20 }
   0xe   :  { %62 = dma.hbm_to_vmem [thread:$0]  %s55_s14, 512, %s57_s17, [#allocation6], %s1819_s25, %s1819_s25, %s1820_s26  }
   0xf   :  { %s84_s21 = sshll.u32 %s1824_s0, 4  ;;  %s85_s21 = int_to_ptr.vmem [resolvable:$true] %s84_s21 }
  0x10   :  { %90 = dma.hbm_to_vmem [thread:$0]  %s83_s20, 512, %s85_s21, [#allocation9], %s1819_s25, %s1819_s25, %s1820_s26  }
  0x11   :  { %1810 = dma.done.wait [#allocation3], 1024  }
  0x12   :  { %1811 = vsyncadd [#allocation3], 4294966272 }
  0x13   :  { %1812 = dma.done.wait [#allocation6], 768  }
  0x14   :  { %1813 = vsyncadd [#allocation6], 4294966528 }
  0x15   :  { %1814 = dma.done.wait [#allocation9], 1024  }
  0x16   :  { %1815 = vsyncadd [#allocation9], 4294966272  ;;  %vm156_vm0 = vcmask 1043456   ;;  %v1907_v0 = vld [vmem:[%s2243_s2 + $0x18] sm:$0xff]  ;;  %v126_v1 = vld [vmem:[#allocation5 + $0x8] sm:$0xf] }
  0x17   :  { %v1912_v2 = vld [vmem:[%s2243_s2 + $0x10] sm:$0xff]  ;;  %233 = vmatpush.msra.mxu1 %v1907_v0  ;;  %1470 = vmatpush.msk.msra.mxu0 %vm156_vm0, %v126_v1  ;;  %v125_v3 = vld [vmem:[#allocation5] sm:$0xff]  ;;  %vm131_vm1 = vcmask 97280   ;;  %v1918_v5 = vld [vmem:[%s2243_s2 + $0x8] sm:$0xff]  ;;  %v1825_v7 = vmov 0.0   ;;  %s1826_s29 = smov 64  }
  0x18   :  { %v117_v4 = vld [vmem:[#allocation2] sm:$0xff]  ;;  %s1827_s30 = smov 32   ;;  %v1950_v33 = vld [vmem:[#allocation8 + $0x18] sm:$0xff]  ;;  %v1960_v37 = vld [vmem:[#allocation8 + $0x8] sm:$0xff]  ;;  %vm217_vm6 = vcmask 261120   ;;  %s1828_s23 = smov [#allocation11]  }
  0x19   :  { %234 = vmatpush.msra.mxu1 %v1912_v2  ;;  %175 = vmatpush.msra.mxu0 %v125_v3  ;;  %v1925_v6 = vld [vmem:[%s2243_s2] sm:$0xff]  ;;  %v1952_v34 = vld [vmem:[#allocation7 + $0x18] sm:$0xff]  ;;  %v1962_v38 = vld [vmem:[#allocation7 + $0x8] sm:$0xff]  ;;  %s1456_s24 = sshll.u32 %s1828_s23, 4  ;;  %s1457_s24 = int_to_ptr.vmem [resolvable:$true] %s1456_s24 }
  0x1a   :  { %1471 = vmatmul.msk.f32.vlgmr.msra.gmra.mxu0 %vm131_vm1, %v117_v4  ;;  %v1941_v8 = vld [vmem:[%s2244_s3] ss:$0 sm:$0xff]  ;;  %291 = vmatpush.msra.mxu2 %v1950_v33  ;;  %v118_v39 = vld [vmem:[#allocation2 + $0x8] sm:$0xff]  ;;  %v1967_v40 = vld [vmem:[#allocation8] sm:$0xff] }
  0x1b   :  { %235 = vmatpush.msra.mxu1 %v1918_v5  ;;  %v1954_v35 = vld [vmem:[#allocation8 + $0x10] sm:$0xff]  ;;  %316 = vmatpush.msra.mxu3 %v1952_v34  ;;  %v1969_v41 = vld [vmem:[#allocation7] sm:$0xff] }
  0x1c   :  { %v1958_v36 = vld [vmem:[#allocation7 + $0x10] sm:$0xff]  ;;  %292 = vmatpush.msra.mxu2 %v1954_v35 }
  0x1d   :  { %236 = vmatpush.msra.mxu1 %v1925_v6  ;;  %317 = vmatpush.msra.mxu3 %v1958_v36  ;;  %v2002_v46 = vld [vmem:[%s2247_s6] ss:$0 sm:$0xff] }
  0x1e   :  { %237 = vmatmul.f32.vlgmr.msra.gmra.mxu1 %v1825_v7  ;;  %293 = vmatpush.msra.mxu2 %v1960_v37 }
  0x1f   :  { %374 = vmatpush.msrb.mxu1 %v1907_v0  ;;  %318 = vmatpush.msra.mxu3 %v1962_v38 }
  0x20   :  { %294 = vmatpush.msra.mxu2 %v1967_v40 }
  0x21   :  { %375 = vmatpush.msrb.mxu1 %v1912_v2  ;;  %319 = vmatpush.msra.mxu3 %v1969_v41 }
  0x22   :  { %1472 = vmatmul.msk.f32.gmra.mxu0 %vm131_vm1, %v118_v39  ;;  %295 = vmatmul.f32.vlgmr.msra.gmra.mxu2 %v1825_v7 }
  0x23   :  { %376 = vmatpush.msrb.mxu1 %v1918_v5  ;;  %462 = vmatpush.msrb.mxu3 %v1952_v34 }
  0x24   :  { %437 = vmatpush.msrb.mxu2 %v1950_v33 }
  0x25   :  { %377 = vmatpush.msrb.mxu1 %v1925_v6  ;;  %463 = vmatpush.msrb.mxu3 %v1958_v36 }
  0x26   :  { %438 = vmatpush.msrb.mxu2 %v1954_v35 }
  0x27   :  { %520 = vmatpush.msra.mxu1 %v1907_v0  ;;  %464 = vmatpush.msrb.mxu3 %v1962_v38 }
  0x28   :  { %439 = vmatpush.msrb.mxu2 %v1960_v37 }
  0x29   :  { %521 = vmatpush.msra.mxu1 %v1912_v2  ;;  %465 = vmatpush.msrb.mxu3 %v1969_v41 }
  0x2a   :  { %440 = vmatpush.msrb.mxu2 %v1967_v40 }
  0x2b   :  { %522 = vmatpush.msra.mxu1 %v1918_v5 }
  0x2c   :  { %583 = vmatpush.msra.mxu2 %v1950_v33 }
  0x2d   :  { %523 = vmatpush.msra.mxu1 %v1925_v6 }
  0x2e   :  { %584 = vmatpush.msra.mxu2 %v1954_v35 }
  0x30   :  { %585 = vmatpush.msra.mxu2 %v1960_v37 }
  0x32   :  { %586 = vmatpush.msra.mxu2 %v1967_v40 }
  0x97   :  { %v177_v9 = vpop.f32.mrf.mxu0 }
  0x98   :  { %v178_v10 = vadd.f32 %v1941_v8, %v177_v9 }
  0x9b   :  { %v238_v11 = vpop.f32.mrf.mxu1 }
  0x9c   :  { %v241_v12 = vadd.f32 %v238_v11, %v178_v10 }
  0x9e   :  { %1534 = vtanh.f32 %v241_v12  ;;  %v1479_v14 = vmul.f32 -1.442695, %v241_v12 }
  0x9f   :  { %v180_v49 = vpop.f32.mrf.mxu0 }
  0xa0   :  { %1536 = vpow2.f32 %v1479_v14  ;;  %v181_v51 = vadd.f32 %v1941_v8, %v180_v49 }
  0xa4   :  { %v1535_v13 = vpop.eup %1534 }
  0xa5   :  { %264 = vrot.lane.b32.xlu0 %v1535_v13, %s1826_s29  ;;  %v296_v45 = vpop.f32.mrf.mxu2 }
  0xa6   :  { %v1537_v15 = vpop.eup %1536 }
  0xa7   :  { %v245_v16 = vadd.f32 1.0, %v1537_v15 }
  0xa9   :  { %1538 = vrcp.f32 %v245_v16  ;;  %v257_v22 = vand.u32 2147483648, %v245_v16  ;;  %vm251_vm3 = vweird.f32 %v245_v16  ;;  %v255_v23 = vand.u32 2147483647, %v245_v16 }
  0xab   :  { %v258_v25 = vor.u32 1.1754944e-38, %v257_v22  ;;  %vm256_vm5 = vcmp.eq.f32.partialorder %v255_v23, 8.507059e+37 }
  0xaf   :  { %v1539_v17 = vpop.eup %1538 }
  0xb0   :  { %v247_v18 = vmul.f32 %v1539_v17, %v245_v16  ;;  %vm252_vm2 = vweird.f32 %v1539_v17 }
  0xb1   :  { %vm253_vm4 = vmor %vm251_vm3, %vm252_vm2 }
  0xb2   :  { %v248_v19 = vsub.f32 1.0, %v247_v18 }
  0xb4   :  { %v249_v20 = vmul.f32 %v1539_v17, %v248_v19 }
  0xb6   :  { %v250_v21 = vadd.f32 %v1539_v17, %v249_v20 }
  0xb8   :  { %v254_v24 = vsel %vm253_vm4, %v1539_v17, %v250_v21 }
  0xb9   :  { %v259_v27 = vsel %vm256_vm5, %v258_v25, %v254_v24 }
  0xba   :  { %v262_v29 = vmul.f32 0.0, %v259_v27 }
 0x117   :  { %v265_v26 = vpop.permute.xlu0 %264 }
 0x118   :  { %v267_v28 = vmul.f32 %v265_v26, %v259_v27 }
 0x11a   :  { %269 = vrot.lane.b32.xlu0 %v267_v28, %s1827_s30 }
 0x18c   :  { %v270_v30 = vpop.permute.xlu0 %269 }
 0x18d   :  { %v1946_v31 = vadd.f32 %v270_v30, %v262_v29 }
 0x18f   :  { %1540 = vtanh.f32 %v1946_v31 }
 0x195   :  { %v1541_v32 = vpop.eup %1540 }
 0x196   :  { %275 = vrot.lane.b32.xlu1 %v1541_v32, %s1826_s29 }
 0x208   :  { %v276_v42 = vpop.permute.xlu1 %275 }
 0x209   :  { %v278_v43 = vmul.f32 %v276_v42, %v259_v27 }
 0x20b   :  { %300 = vrot.lane.b32.xlu1 %v278_v43, %s1827_s30 }
 0x27d   :  { %v301_v44 = vpop.permute.xlu1 %300 }
 0x27e   :  { %1480 = vmatmul.msk.f32.vlgmr.msra.gmra.mxu3 %vm217_vm6, %v301_v44  ;;  %1482 = vmatmul.msk.f32.vlgmr.msrb.gmra.mxu1 %vm217_vm6, %v301_v44 }
 0x27f   :  { %666 = vmatpush.msrb.mxu1 %v1907_v0  ;;  %608 = vmatpush.msra.mxu3 %v1952_v34 }
 0x281   :  { %667 = vmatpush.msrb.mxu1 %v1912_v2  ;;  %609 = vmatpush.msra.mxu3 %v1958_v36 }
 0x283   :  { %668 = vmatpush.msrb.mxu1 %v1918_v5  ;;  %610 = vmatpush.msra.mxu3 %v1962_v38 }
 0x285   :  { %669 = vmatpush.msrb.mxu1 %v1925_v6  ;;  %611 = vmatpush.msra.mxu3 %v1969_v41 }
 0x2fb   :  { %v379_v52 = vpop.f32.mrf.mxu1 }
 0x2fc   :  { %v382_v53 = vadd.f32 %v379_v52, %v181_v51 }
 0x2fe   :  { %v1483_v57 = vmul.f32 -1.442695, %v382_v53 }
 0x301   :  { %v321_v47 = vpop.f32.mrf.mxu3 }
 0x302   :  { %v322_v48 = vadd.f32 %v321_v47, %v296_v45 }
 0x304   :  { %v324_v50 = vadd.f32 %v2002_v46, %v322_v48 }
 0x306   :  { %1542 = vtanh.f32 %v324_v50  ;;  %v1481_v56 = vmul.f32 -1.442695, %v324_v50 }
 0x307   :  { %1544 = vtanh.f32 %v382_v53 }
 0x308   :  { %1546 = vpow2.f32 %v1481_v56 }
 0x309   :  { %1548 = vpow2.f32 %v1483_v57 }
 0x30c   :  { %v1543_v54 = vpop.eup %1542 }
 0x30d   :  { %347 = vrot.lane.b32.xlu2 %v1543_v54, %s1826_s29  ;;  %v1545_v55 = vpop.eup %1544 }
 0x30e   :  { %v1547_v58 = vpop.eup %1546 }
 0x30f   :  { %v328_v59 = vadd.f32 1.0, %v1547_v58  ;;  %v1549_v60 = vpop.eup %1548 }
 0x310   :  { %v386_v61 = vadd.f32 1.0, %v1549_v60 }
 0x311   :  { %1550 = vrcp.f32 %v328_v59  ;;  %v340_v11 = vand.u32 2147483648, %v328_v59  ;;  %vm334_vm8 = vweird.f32 %v328_v59  ;;  %v338_v12 = vand.u32 2147483647, %v328_v59 }
 0x312   :  { %1552 = vrcp.f32 %v386_v61  ;;  %v398_v20 = vand.u32 2147483648, %v386_v61  ;;  %vm392_vm12 = vweird.f32 %v386_v61  ;;  %v396_v21 = vand.u32 2147483647, %v386_v61 }
 0x313   :  { %v341_v15 = vor.u32 1.1754944e-38, %v340_v11  ;;  %vm339_vm10 = vcmp.eq.f32.partialorder %v338_v12, 8.507059e+37 }
 0x314   :  { %v399_v23 = vor.u32 1.1754944e-38, %v398_v20  ;;  %vm397_vm14 = vcmp.eq.f32.partialorder %v396_v21, 8.507059e+37 }
 0x315   :  { %405 = vrot.lane.b32.xlu2 %v1545_v55, %s1826_s29 }
 0x317   :  { %v1551_v62 = vpop.eup %1550 }
 0x318   :  { %v330_v63 = vmul.f32 %v1551_v62, %v328_v59  ;;  %v1553_v3 = vpop.eup %1552  ;;  %vm335_vm7 = vweird.f32 %v1551_v62 }
 0x319   :  { %v388_v7 = vmul.f32 %v1553_v3, %v386_v61  ;;  %vm336_vm9 = vmor %vm334_vm8, %vm335_vm7  ;;  %vm393_vm11 = vweird.f32 %v1553_v3 }
 0x31a   :  { %v331_v1 = vsub.f32 1.0, %v330_v63  ;;  %vm394_vm13 = vmor %vm392_vm12, %vm393_vm11 }
 0x31b   :  { %v389_v10 = vsub.f32 1.0, %v388_v7 }
 0x31c   :  { %v332_v4 = vmul.f32 %v1551_v62, %v331_v1 }
 0x31d   :  { %v390_v14 = vmul.f32 %v1553_v3, %v389_v10 }
 0x31e   :  { %v333_v9 = vadd.f32 %v1551_v62, %v332_v4 }
 0x31f   :  { %v391_v19 = vadd.f32 %v1553_v3, %v390_v14 }
 0x320   :  { %v337_v13 = vsel %vm336_vm9, %v1551_v62, %v333_v9 }
 0x321   :  { %v342_v17 = vsel %vm339_vm10, %v341_v15, %v337_v13  ;;  %v395_v22 = vsel %vm394_vm13, %v1553_v3, %v391_v19 }
 0x322   :  { %v400_v24 = vsel %vm397_vm14, %v399_v23, %v395_v22  ;;  %v345_v27 = vmul.f32 0.0, %v342_v17 }
 0x323   :  { %v403_v30 = vmul.f32 %v400_v24, %v1946_v31  ;;  %v119_v31 = vld [vmem:[#allocation2 + $0x10] sm:$0xff] }
 0x324   :  { %1473 = vmatmul.msk.f32.gmra.mxu0 %vm131_vm1, %v119_v31 }
 0x367   :  { %v348_v16 = vpop.permute.xlu2 %347 }
 0x368   :  { %v350_v18 = vmul.f32 %v348_v16, %v342_v17 }
 0x36a   :  { %352 = vrot.lane.b32.xlu0 %v350_v18, %s1827_s30 }
 0x36f   :  { %v406_v25 = vpop.permute.xlu2 %405 }
 0x370   :  { %v408_v26 = vmul.f32 %v406_v25, %v400_v24 }
 0x372   :  { %410 = vrot.lane.b32.xlu1 %v408_v26, %s1827_s30 }
 0x3a1   :  { %v183_v51 = vpop.f32.mrf.mxu0 }
 0x3a2   :  { %v184_v52 = vadd.f32 %v1941_v8, %v183_v51  ;;  %v120_v51 = vld [vmem:[#allocation2 + $0x18] sm:$0xff] }
 0x3a3   :  { %1474 = vmatmul.msk.f32.gmra.mxu0 %vm131_vm1, %v120_v51 }
 0x3dc   :  { %v353_v28 = vpop.permute.xlu0 %352 }
 0x3dd   :  { %v2010_v29 = vadd.f32 %v353_v28, %v345_v27 }
 0x3df   :  { %1554 = vtanh.f32 %v2010_v29 }
 0x3e4   :  { %v411_v32 = vpop.permute.xlu1 %410 }
 0x3e5   :  { %v1555_v39 = vpop.eup %1554  ;;  %v2014_v42 = vadd.f32 %v411_v32, %v403_v30 }
 0x3e6   :  { %358 = vrot.lane.b32.xlu2 %v1555_v39, %s1826_s29 }
 0x3e7   :  { %1556 = vtanh.f32 %v2014_v42 }
 0x3ed   :  { %v1557_v43 = vpop.eup %1556 }
 0x3ee   :  { %416 = vrot.lane.b32.xlu0 %v1557_v43, %s1826_s29 }
 0x440   :  { %v359_v44 = vpop.permute.xlu2 %358 }
 0x441   :  { %v361_v45 = vmul.f32 %v359_v44, %v342_v17 }
 0x443   :  { %421 = vrot.lane.b32.xlu1 %v361_v45, %s1827_s30 }
 0x460   :  { %v417_v47 = vpop.permute.xlu0 %416 }
 0x461   :  { %v419_v48 = vmul.f32 %v417_v47, %v400_v24 }
 0x463   :  { %446 = vrot.lane.b32.xlu2 %v419_v48, %s1827_s30 }
 0x4b5   :  { %v422_v49 = vpop.permute.xlu1 %421 }
 0x4b6   :  { %1484 = vmatmul.msk.f32.vlgmr.msrb.gmra.mxu2 %vm217_vm6, %v422_v49 }
 0x4b7   :  { %729 = vmatpush.msrb.mxu2 %v1950_v33 }
 0x4b9   :  { %730 = vmatpush.msrb.mxu2 %v1954_v35 }
 0x4bb   :  { %731 = vmatpush.msrb.mxu2 %v1960_v37 }
 0x4bd   :  { %v447_v50 = vpop.permute.xlu2 %446  ;;  %732 = vmatpush.msrb.mxu2 %v1967_v40 }
 0x4be   :  { %1485 = vmatmul.msk.f32.vlgmr.msrb.gmra.mxu3 %vm217_vm6, %v447_v50  ;;  %1487 = vmatmul.msk.f32.vlgmr.msra.gmra.mxu1 %vm217_vm6, %v447_v50 }
 0x4bf   :  { %754 = vmatpush.msrb.mxu3 %v1952_v34  ;;  %812 = vmatpush.msra.mxu1 %v1907_v0 }
 0x4c1   :  { %755 = vmatpush.msrb.mxu3 %v1958_v36  ;;  %813 = vmatpush.msra.mxu1 %v1912_v2 }
 0x4c3   :  { %756 = vmatpush.msrb.mxu3 %v1962_v38  ;;  %814 = vmatpush.msra.mxu1 %v1918_v5 }
 0x4c5   :  { %757 = vmatpush.msrb.mxu3 %v1969_v41  ;;  %815 = vmatpush.msra.mxu1 %v1925_v6 }
 0x539   :  { %v442_v55 = vpop.f32.mrf.mxu2 }
 0x53b   :  { %v525_v53 = vpop.f32.mrf.mxu1 }
 0x53c   :  { %v528_v54 = vadd.f32 %v525_v53, %v184_v52 }
 0x53e   :  { %1558 = vtanh.f32 %v528_v54  ;;  %v1488_v61 = vmul.f32 -1.442695, %v528_v54 }
 0x541   :  { %v467_v56 = vpop.f32.mrf.mxu3 }
 0x542   :  { %v468_v57 = vadd.f32 %v467_v56, %v442_v55  ;;  %v186_v56 = vpop.f32.mrf.mxu0 }
 0x544   :  { %v1559_v58 = vpop.eup %1558  ;;  %v470_v59 = vadd.f32 %v2002_v46, %v468_v57  ;;  %v187_v57 = vadd.f32 %v1941_v8, %v186_v56 }
 0x545   :  { %551 = vrot.lane.b32.xlu1 %v1559_v58, %s1826_s29 }
 0x546   :  { %1560 = vtanh.f32 %v470_v59  ;;  %v1486_v62 = vmul.f32 -1.442695, %v470_v59 }
 0x547   :  { %1562 = vpow2.f32 %v1488_v61 }
 0x548   :  { %1564 = vpow2.f32 %v1486_v62 }
 0x54c   :  { %v1561_v60 = vpop.eup %1560 }
 0x54d   :  { %493 = vrot.lane.b32.xlu0 %v1561_v60, %s1826_s29  ;;  %v1563_v63 = vpop.eup %1562 }
 0x54e   :  { %v532_v1 = vadd.f32 1.0, %v1563_v63  ;;  %v1565_v3 = vpop.eup %1564 }
 0x54f   :  { %v474_v4 = vadd.f32 1.0, %v1565_v3 }
 0x550   :  { %1566 = vrcp.f32 %v532_v1  ;;  %v544_v16 = vand.u32 2147483648, %v532_v1  ;;  %vm538_vm0 = vweird.f32 %v532_v1  ;;  %v542_v17 = vand.u32 2147483647, %v532_v1 }
 0x551   :  { %1568 = vrcp.f32 %v474_v4  ;;  %v486_v25 = vand.u32 2147483648, %v474_v4  ;;  %vm480_vm5 = vweird.f32 %v474_v4  ;;  %v484_v26 = vand.u32 2147483647, %v474_v4 }
 0x552   :  { %v545_v20 = vor.u32 1.1754944e-38, %v544_v16  ;;  %vm543_vm3 = vcmp.eq.f32.partialorder %v542_v17, 8.507059e+37 }
 0x553   :  { %v487_v28 = vor.u32 1.1754944e-38, %v486_v25  ;;  %vm485_vm8 = vcmp.eq.f32.partialorder %v484_v26, 8.507059e+37 }
 0x556   :  { %v1567_v7 = vpop.eup %1566 }
 0x557   :  { %v534_v9 = vmul.f32 %v1567_v7, %v532_v1  ;;  %v1569_v11 = vpop.eup %1568  ;;  %vm539_vm15 = vweird.f32 %v1567_v7 }
 0x558   :  { %v476_v13 = vmul.f32 %v1569_v11, %v474_v4  ;;  %vm540_vm2 = vmor %vm538_vm0, %vm539_vm15  ;;  %vm481_vm4 = vweird.f32 %v1569_v11 }
 0x559   :  { %v535_v10 = vsub.f32 1.0, %v534_v9  ;;  %vm482_vm7 = vmor %vm480_vm5, %vm481_vm4 }
 0x55a   :  { %v477_v15 = vsub.f32 1.0, %v476_v13 }
 0x55b   :  { %v536_v12 = vmul.f32 %v1567_v7, %v535_v10 }
 0x55c   :  { %v478_v19 = vmul.f32 %v1569_v11, %v477_v15 }
 0x55d   :  { %v537_v14 = vadd.f32 %v1567_v7, %v536_v12 }
 0x55e   :  { %v479_v24 = vadd.f32 %v1569_v11, %v478_v19 }
 0x55f   :  { %v541_v18 = vsel %vm540_vm2, %v1567_v7, %v537_v14 }
 0x560   :  { %v546_v22 = vsel %vm543_vm3, %v545_v20, %v541_v18  ;;  %v483_v27 = vsel %vm482_vm7, %v1569_v11, %v479_v24 }
 0x561   :  { %v488_v32 = vsel %vm485_vm8, %v487_v28, %v483_v27  ;;  %v549_v48 = vmul.f32 %v546_v22, %v2014_v42 }
 0x562   :  { %v491_v43 = vmul.f32 %v488_v32, %v2010_v29 }
 0x5b7   :  { %v552_v21 = vpop.permute.xlu1 %551 }
 0x5b8   :  { %v554_v23 = vmul.f32 %v552_v21, %v546_v22 }
 0x5ba   :  { %556 = vrot.lane.b32.xlu0 %v554_v23, %s1827_s30 }
 0x5bf   :  { %v494_v30 = vpop.permute.xlu0 %493 }
 0x5c0   :  { %v496_v39 = vmul.f32 %v494_v30, %v488_v32 }
 0x5c2   :  { %498 = vrot.lane.b32.xlu2 %v496_v39, %s1827_s30 }
 0x61c   :  { %v499_v44 = vpop.permute.xlu2 %498 }
 0x61d   :  { %v2044_v45 = vadd.f32 %v499_v44, %v491_v43 }
 0x61f   :  { %1570 = vtanh.f32 %v2044_v45 }
 0x625   :  { %v1571_v47 = vpop.eup %1570 }
 0x626   :  { %504 = vrot.lane.b32.xlu1 %v1571_v47, %s1826_s29 }
 0x62c   :  { %v557_v31 = vpop.permute.xlu0 %556 }
 0x62d   :  { %v2049_v49 = vadd.f32 %v557_v31, %v549_v48 }
 0x62f   :  { %1572 = vtanh.f32 %v2049_v49 }
 0x635   :  { %v1573_v50 = vpop.eup %1572 }
 0x636   :  { %562 = vrot.lane.b32.xlu2 %v1573_v50, %s1826_s29 }
 0x690   :  { %v563_v29 = vpop.permute.xlu2 %562 }
 0x691   :  { %v565_v52 = vmul.f32 %v563_v29, %v546_v22 }
 0x693   :  { %592 = vrot.lane.b32.xlu1 %v565_v52, %s1827_s30 }
 0x698   :  { %v505_v53 = vpop.permute.xlu1 %504 }
 0x699   :  { %v507_v54 = vmul.f32 %v505_v53, %v488_v32 }
 0x69b   :  { %567 = vrot.lane.b32.xlu0 %v507_v54, %s1827_s30 }
 0x705   :  { %v593_v42 = vpop.permute.xlu1 %592 }
 0x706   :  { %1490 = vmatmul.msk.f32.vlgmr.msra.gmra.mxu3 %vm217_vm6, %v593_v42  ;;  %1492 = vmatmul.msk.f32.vlgmr.msrb.gmra.mxu1 %vm217_vm6, %v593_v42 }
 0x707   :  { %900 = vmatpush.msra.mxu3 %v1952_v34  ;;  %958 = vmatpush.msrb.mxu1 %v1907_v0 }
 0x709   :  { %901 = vmatpush.msra.mxu3 %v1958_v36  ;;  %959 = vmatpush.msrb.mxu1 %v1912_v2 }
 0x70b   :  { %902 = vmatpush.msra.mxu3 %v1962_v38  ;;  %960 = vmatpush.msrb.mxu1 %v1918_v5 }
 0x70d   :  { %v568_v55 = vpop.permute.xlu0 %567  ;;  %903 = vmatpush.msra.mxu3 %v1969_v41  ;;  %961 = vmatpush.msrb.mxu1 %v1925_v6 }
 0x70e   :  { %1489 = vmatmul.msk.f32.vlgmr.msra.gmra.mxu2 %vm217_vm6, %v568_v55 }
 0x70f   :  { %875 = vmatpush.msra.mxu2 %v1950_v33 }
 0x711   :  { %876 = vmatpush.msra.mxu2 %v1954_v35 }
 0x713   :  { %877 = vmatpush.msra.mxu2 %v1960_v37 }
 0x715   :  { %878 = vmatpush.msra.mxu2 %v1967_v40 }
 0x783   :  { %v671_v58 = vpop.f32.mrf.mxu1 }
 0x784   :  { %v674_v59 = vadd.f32 %v671_v58, %v187_v57 }
 0x786   :  { %1574 = vtanh.f32 %v674_v59  ;;  %v1493_v7 = vmul.f32 -1.442695, %v674_v59  ;;  %v121_v59 = vld [vmem:[#allocation2 + $0x20] sm:$0xff] }
 0x787   :  { %1475 = vmatmul.msk.f32.gmra.mxu0 %vm131_vm1, %v121_v59 }
 0x789   :  { %v613_v61 = vpop.f32.mrf.mxu3 }
 0x78c   :  { %v1575_v60 = vpop.eup %1574 }
 0x78d   :  { %697 = vrot.lane.b32.xlu0 %v1575_v60, %s1826_s29 }
 0x791   :  { %v588_v62 = vpop.f32.mrf.mxu2 }
 0x792   :  { %v614_v63 = vadd.f32 %v613_v61, %v588_v62 }
 0x794   :  { %v616_v1 = vadd.f32 %v2002_v46, %v614_v63 }
 0x796   :  { %1576 = vtanh.f32 %v616_v1  ;;  %v1491_v4 = vmul.f32 -1.442695, %v616_v1 }
 0x798   :  { %1578 = vpow2.f32 %v1491_v4 }
 0x799   :  { %1580 = vpow2.f32 %v1493_v7 }
 0x79c   :  { %v1577_v3 = vpop.eup %1576 }
 0x79d   :  { %639 = vrot.lane.b32.xlu2 %v1577_v3, %s1826_s29 }
 0x79e   :  { %v1579_v9 = vpop.eup %1578 }
 0x79f   :  { %v620_v10 = vadd.f32 1.0, %v1579_v9  ;;  %v1581_v11 = vpop.eup %1580 }
 0x7a0   :  { %v678_v12 = vadd.f32 1.0, %v1581_v11 }
 0x7a1   :  { %1582 = vrcp.f32 %v620_v10  ;;  %v632_v21 = vand.u32 2147483648, %v620_v10  ;;  %vm626_vm10 = vweird.f32 %v620_v10  ;;  %v630_v22 = vand.u32 2147483647, %v620_v10 }
 0x7a2   :  { %1584 = vrcp.f32 %v678_v12  ;;  %v690_v32 = vand.u32 2147483648, %v678_v12  ;;  %vm684_vm14 = vweird.f32 %v678_v12  ;;  %v688_v39 = vand.u32 2147483647, %v678_v12 }
 0x7a3   :  { %v633_v25 = vor.u32 1.1754944e-38, %v632_v21  ;;  %vm631_vm12 = vcmp.eq.f32.partialorder %v630_v22, 8.507059e+37 }
 0x7a4   :  { %v691_v44 = vor.u32 1.1754944e-38, %v690_v32  ;;  %vm689_vm0 = vcmp.eq.f32.partialorder %v688_v39, 8.507059e+37 }
 0x7a7   :  { %v1583_v13 = vpop.eup %1582 }
 0x7a8   :  { %v622_v14 = vmul.f32 %v1583_v13, %v620_v10  ;;  %v1585_v16 = vpop.eup %1584  ;;  %vm627_vm9 = vweird.f32 %v1583_v13 }
 0x7a9   :  { %v680_v18 = vmul.f32 %v1585_v16, %v678_v12  ;;  %vm628_vm11 = vmor %vm626_vm10, %vm627_vm9  ;;  %vm685_vm13 = vweird.f32 %v1585_v16 }
 0x7aa   :  { %v623_v15 = vsub.f32 1.0, %v622_v14  ;;  %vm686_vm15 = vmor %vm684_vm14, %vm685_vm13 }
 0x7ab   :  { %v681_v20 = vsub.f32 1.0, %v680_v18 }
 0x7ac   :  { %v624_v17 = vmul.f32 %v1583_v13, %v623_v15 }
 0x7ad   :  { %v682_v24 = vmul.f32 %v1585_v16, %v681_v20 }
 0x7ae   :  { %v625_v19 = vadd.f32 %v1583_v13, %v624_v17 }
 0x7af   :  { %v683_v30 = vadd.f32 %v1585_v16, %v682_v24 }
 0x7b0   :  { %v629_v23 = vsel %vm628_vm11, %v1583_v13, %v625_v19 }
 0x7b1   :  { %v634_v27 = vsel %vm631_vm12, %v633_v25, %v629_v23  ;;  %v687_v43 = vsel %vm686_vm15, %v1585_v16, %v683_v30 }
 0x7b2   :  { %v692_v48 = vsel %vm689_vm0, %v691_v44, %v687_v43  ;;  %v637_v53 = vmul.f32 %v634_v27, %v2044_v45 }
 0x7b3   :  { %v695_v50 = vmul.f32 %v692_v48, %v2049_v49 }
 0x7f7   :  { %v640_v26 = vpop.permute.xlu2 %639 }
 0x7f8   :  { %v642_v28 = vmul.f32 %v640_v26, %v634_v27 }
 0x7fa   :  { %644 = vrot.lane.b32.xlu1 %v642_v28, %s1827_s30 }
 0x7ff   :  { %v698_v47 = vpop.permute.xlu0 %697 }
 0x800   :  { %v700_v31 = vmul.f32 %v698_v47, %v692_v48 }
 0x802   :  { %702 = vrot.lane.b32.xlu2 %v700_v31, %s1827_s30 }
 0x804   :  { %v189_v61 = vpop.f32.mrf.mxu0 }
 0x805   :  { %v190_v62 = vadd.f32 %v1941_v8, %v189_v61  ;;  %v122_v61 = vld [vmem:[#allocation2 + $0x28] sm:$0xff] }
 0x806   :  { %1476 = vmatmul.msk.f32.gmra.mxu0 %vm131_vm1, %v122_v61 }
 0x85c   :  { %v703_v51 = vpop.permute.xlu2 %702 }
 0x85d   :  { %v2078_v29 = vadd.f32 %v703_v51, %v695_v50 }
 0x85f   :  { %1586 = vtanh.f32 %v2078_v29 }
 0x865   :  { %v1587_v52 = vpop.eup %1586 }
 0x866   :  { %708 = vrot.lane.b32.xlu1 %v1587_v52, %s1826_s29 }
 0x86c   :  { %v645_v54 = vpop.permute.xlu1 %644 }
 0x86d   :  { %v2083_v42 = vadd.f32 %v645_v54, %v637_v53 }
 0x86f   :  { %1588 = vtanh.f32 %v2083_v42 }
 0x875   :  { %v1589_v55 = vpop.eup %1588 }
 0x876   :  { %650 = vrot.lane.b32.xlu0 %v1589_v55, %s1826_s29 }
 0x8d8   :  { %v709_v56 = vpop.permute.xlu1 %708 }
 0x8d9   :  { %v711_v49 = vmul.f32 %v709_v56, %v692_v48 }
 0x8db   :  { %738 = vrot.lane.b32.xlu0 %v711_v49, %s1827_s30 }
 0x8e8   :  { %v651_v57 = vpop.permute.xlu0 %650 }
 0x8e9   :  { %v653_v58 = vmul.f32 %v651_v57, %v634_v27 }
 0x8eb   :  { %713 = vrot.lane.b32.xlu2 %v653_v58, %s1827_s30 }
 0x945   :  { %v714_v45 = vpop.permute.xlu2 %713 }
 0x946   :  { %1494 = vmatmul.msk.f32.vlgmr.msrb.gmra.mxu2 %vm217_vm6, %v714_v45 }
 0x947   :  { %1021 = vmatpush.msrb.mxu2 %v1950_v33 }
 0x949   :  { %1022 = vmatpush.msrb.mxu2 %v1954_v35 }
 0x94b   :  { %1023 = vmatpush.msrb.mxu2 %v1960_v37 }
 0x94d   :  { %v739_v60 = vpop.permute.xlu0 %738  ;;  %1024 = vmatpush.msrb.mxu2 %v1967_v40 }
 0x94e   :  { %1495 = vmatmul.msk.f32.vlgmr.msrb.gmra.mxu3 %vm217_vm6, %v739_v60  ;;  %1497 = vmatmul.msk.f32.vlgmr.msra.gmra.mxu1 %vm217_vm6, %v739_v60 }
 0x94f   :  { %1046 = vmatpush.msrb.mxu3 %v1952_v34  ;;  %1104 = vmatpush.msra.mxu1 %v1907_v0 }
 0x951   :  { %1047 = vmatpush.msrb.mxu3 %v1958_v36  ;;  %1105 = vmatpush.msra.mxu1 %v1912_v2 }
 0x953   :  { %1048 = vmatpush.msrb.mxu3 %v1962_v38  ;;  %1106 = vmatpush.msra.mxu1 %v1918_v5 }
 0x955   :  { %1049 = vmatpush.msrb.mxu3 %v1969_v41  ;;  %1107 = vmatpush.msra.mxu1 %v1925_v6 }
 0x9c9   :  { %v734_v3 = vpop.f32.mrf.mxu2 }
 0x9cb   :  { %v817_v63 = vpop.f32.mrf.mxu1 }
 0x9cc   :  { %v820_v1 = vadd.f32 %v817_v63, %v190_v62 }
 0x9ce   :  { %1590 = vtanh.f32 %v820_v1  ;;  %v1498_v12 = vmul.f32 -1.442695, %v820_v1 }
 0x9d1   :  { %v759_v4 = vpop.f32.mrf.mxu3 }
 0x9d2   :  { %v760_v7 = vadd.f32 %v759_v4, %v734_v3 }
 0x9d4   :  { %v1591_v9 = vpop.eup %1590  ;;  %v762_v10 = vadd.f32 %v2002_v46, %v760_v7 }
 0x9d5   :  { %843 = vrot.lane.b32.xlu2 %v1591_v9, %s1826_s29 }
 0x9d6   :  { %1592 = vtanh.f32 %v762_v10  ;;  %v1496_v18 = vmul.f32 -1.442695, %v762_v10 }
 0x9d7   :  { %1594 = vpow2.f32 %v1498_v12 }
 0x9dc   :  { %v1593_v11 = vpop.eup %1592 }
 0x9dd   :  { %785 = vrot.lane.b32.xlu1 %v1593_v11, %s1826_s29  ;;  %v1595_v13 = vpop.eup %1594 }
 0x9de   :  { %v824_v14 = vadd.f32 1.0, %v1595_v13 }
 0x9e0   :  { %1596 = vrcp.f32 %v824_v14  ;;  %v836_v21 = vand.u32 2147483648, %v824_v14  ;;  %vm830_vm3 = vweird.f32 %v824_v14  ;;  %v834_v22 = vand.u32 2147483647, %v824_v14 }
 0x9e1   :  { %1598 = vpow2.f32 %v1496_v18 }
 0x9e2   :  { %v837_v25 = vor.u32 1.1754944e-38, %v836_v21  ;;  %vm835_vm5 = vcmp.eq.f32.partialorder %v834_v22, 8.507059e+37 }
 0x9e6   :  { %v1597_v15 = vpop.eup %1596 }
 0x9e7   :  { %v826_v16 = vmul.f32 %v1597_v15, %v824_v14  ;;  %vm831_vm2 = vweird.f32 %v1597_v15  ;;  %v1599_v23 = vpop.eup %1598 }
 0x9e8   :  { %vm832_vm4 = vmor %vm830_vm3, %vm831_vm2  ;;  %v766_v26 = vadd.f32 1.0, %v1599_v23 }
 0x9e9   :  { %v827_v17 = vsub.f32 1.0, %v826_v16 }
 0x9ea   :  { %1600 = vrcp.f32 %v766_v26  ;;  %v778_v48 = vand.u32 2147483648, %v766_v26  ;;  %vm772_vm8 = vweird.f32 %v766_v26  ;;  %v776_v31 = vand.u32 2147483647, %v766_v26 }
 0x9eb   :  { %v828_v19 = vmul.f32 %v1597_v15, %v827_v17 }
 0x9ec   :  { %v779_v51 = vor.u32 1.1754944e-38, %v778_v48  ;;  %vm777_vm10 = vcmp.eq.f32.partialorder %v776_v31, 8.507059e+37 }
 0x9ed   :  { %v829_v20 = vadd.f32 %v1597_v15, %v828_v19 }
 0x9ef   :  { %v833_v24 = vsel %vm832_vm4, %v1597_v15, %v829_v20 }
 0x9f0   :  { %v838_v28 = vsel %vm835_vm5, %v837_v25, %v833_v24  ;;  %v1601_v32 = vpop.eup %1600 }
 0x9f1   :  { %v768_v39 = vmul.f32 %v1601_v32, %v766_v26  ;;  %vm773_vm7 = vweird.f32 %v1601_v32  ;;  %v841_v55 = vmul.f32 %v838_v28, %v2078_v29 }
 0x9f2   :  { %vm774_vm9 = vmor %vm772_vm8, %vm773_vm7 }
 0x9f3   :  { %v769_v43 = vsub.f32 1.0, %v768_v39 }
 0x9f5   :  { %v770_v44 = vmul.f32 %v1601_v32, %v769_v43 }
 0x9f7   :  { %v771_v47 = vadd.f32 %v1601_v32, %v770_v44 }
 0x9f9   :  { %v775_v50 = vsel %vm774_vm9, %v1601_v32, %v771_v47 }
 0x9fa   :  { %v780_v53 = vsel %vm777_vm10, %v779_v51, %v775_v50 }
 0x9fb   :  { %v783_v58 = vmul.f32 %v780_v53, %v2083_v42 }
 0xa2f   :  { %v844_v27 = vpop.permute.xlu2 %843 }
 0xa30   :  { %v846_v30 = vmul.f32 %v844_v27, %v838_v28 }
 0xa32   :  { %848 = vrot.lane.b32.xlu1 %v846_v30, %s1827_s30 }
 0xa4f   :  { %v786_v52 = vpop.permute.xlu1 %785 }
 0xa50   :  { %v788_v54 = vmul.f32 %v786_v52, %v780_v53 }
 0xa52   :  { %790 = vrot.lane.b32.xlu0 %v788_v54, %s1827_s30 }
 0xaa4   :  { %v849_v56 = vpop.permute.xlu1 %848 }
 0xaa5   :  { %v2112_v49 = vadd.f32 %v849_v56, %v841_v55 }
 0xaa7   :  { %1602 = vtanh.f32 %v2112_v49 }
 0xaad   :  { %v1603_v57 = vpop.eup %1602 }
 0xaae   :  { %854 = vrot.lane.b32.xlu0 %v1603_v57, %s1826_s29 }
 0xac4   :  { %v791_v59 = vpop.permute.xlu0 %790 }
 0xac5   :  { %v2117_v45 = vadd.f32 %v791_v59, %v783_v58 }
 0xac7   :  { %1604 = vtanh.f32 %v2117_v45 }
 0xacd   :  { %v1605_v60 = vpop.eup %1604 }
 0xace   :  { %796 = vrot.lane.b32.xlu2 %v1605_v60, %s1826_s29 }
 0xb20   :  { %v855_v29 = vpop.permute.xlu0 %854 }
 0xb21   :  { %v857_v62 = vmul.f32 %v855_v29, %v838_v28  ;;  %v123_v29 = vld [vmem:[#allocation2 + $0x30] sm:$0xff] }
 0xb22   :  { %1477 = vmatmul.msk.f32.gmra.mxu0 %vm131_vm1, %v123_v29 }
 0xb23   :  { %884 = vrot.lane.b32.xlu2 %v857_v62, %s1827_s30 }
 0xb28   :  { %v797_v63 = vpop.permute.xlu2 %796 }
 0xb29   :  { %v799_v1 = vmul.f32 %v797_v63, %v780_v53 }
 0xb2b   :  { %859 = vrot.lane.b32.xlu1 %v799_v1, %s1827_s30 }
 0xb7d   :  { %v885_v42 = vpop.permute.xlu2 %884 }
 0xb7e   :  { %1500 = vmatmul.msk.f32.vlgmr.msra.gmra.mxu3 %vm217_vm6, %v885_v42  ;;  %1502 = vmatmul.msk.f32.vlgmr.msrb.gmra.mxu1 %vm217_vm6, %v885_v42  ;;  %v1662_v42 = vld [vmem:[#allocation8 + $0x18] sm:$0xff] }
 0xb7f   :  { %1192 = vmatpush.msra.mxu3 %v1952_v34  ;;  %1250 = vmatpush.msrb.mxu1 %v1907_v0  ;;  %v192_v0 = vpop.f32.mrf.mxu0 }
 0xb81   :  { %1193 = vmatpush.msra.mxu3 %v1958_v36  ;;  %1251 = vmatpush.msrb.mxu1 %v1912_v2  ;;  %v193_v2 = vadd.f32 %v1941_v8, %v192_v0 }
 0xb83   :  { %1194 = vmatpush.msra.mxu3 %v1962_v38  ;;  %1252 = vmatpush.msrb.mxu1 %v1918_v5 }
 0xb85   :  { %1195 = vmatpush.msra.mxu3 %v1969_v41  ;;  %1253 = vmatpush.msrb.mxu1 %v1925_v6 }
 0xb9d   :  { %v860_v3 = vpop.permute.xlu1 %859 }
 0xb9e   :  { %1499 = vmatmul.msk.f32.vlgmr.msra.gmra.mxu2 %vm217_vm6, %v860_v3  ;;  %v1663_v3 = vld [vmem:[#allocation8 + $0x10] sm:$0xff] }
 0xb9f   :  { %1167 = vmatpush.msra.mxu2 %v1950_v33  ;;  %v195_v0 = vpop.f32.mrf.mxu0 }
 0xba1   :  { %1168 = vmatpush.msra.mxu2 %v1954_v35 }
 0xba3   :  { %1169 = vmatpush.msra.mxu2 %v1960_v37 }
 0xba5   :  { %1170 = vmatpush.msra.mxu2 %v1967_v40 }
 0xbfb   :  { %v963_v4 = vpop.f32.mrf.mxu1 }
 0xbfc   :  { %v966_v5 = vadd.f32 %v963_v4, %v193_v2 }
 0xbfe   :  { %1606 = vtanh.f32 %v966_v5  ;;  %v1503_v11 = vmul.f32 -1.442695, %v966_v5 }
 0xc01   :  { %v905_v6 = vpop.f32.mrf.mxu3 }
 0xc04   :  { %v1607_v7 = vpop.eup %1606 }
 0xc05   :  { %989 = vrot.lane.b32.xlu1 %v1607_v7, %s1826_s29 }
 0xc21   :  { %v880_v9 = vpop.f32.mrf.mxu2 }
 0xc22   :  { %v906_v10 = vadd.f32 %v905_v6, %v880_v9 }
 0xc24   :  { %v908_v33 = vadd.f32 %v2002_v46, %v906_v10 }
 0xc26   :  { %1608 = vtanh.f32 %v908_v33  ;;  %v1501_v19 = vmul.f32 -1.442695, %v908_v33 }
 0xc27   :  { %1610 = vpow2.f32 %v1503_v11 }
 0xc2c   :  { %v1609_v35 = vpop.eup %1608 }
 0xc2d   :  { %931 = vrot.lane.b32.xlu0 %v1609_v35, %s1826_s29  ;;  %v1611_v12 = vpop.eup %1610 }
 0xc2e   :  { %v970_v13 = vadd.f32 1.0, %v1611_v12 }
 0xc30   :  { %1612 = vrcp.f32 %v970_v13  ;;  %v982_v18 = vand.u32 2147483648, %v970_v13  ;;  %vm976_vm12 = vweird.f32 %v970_v13  ;;  %v980_v20 = vand.u32 2147483647, %v970_v13 }
 0xc31   :  { %1614 = vpow2.f32 %v1501_v19 }
 0xc32   :  { %v983_v22 = vor.u32 1.1754944e-38, %v982_v18  ;;  %vm981_vm14 = vcmp.eq.f32.partialorder %v980_v20, 8.507059e+37 }
 0xc36   :  { %v1613_v8 = vpop.eup %1612 }
 0xc37   :  { %v972_v14 = vmul.f32 %v1613_v8, %v970_v13  ;;  %vm977_vm11 = vweird.f32 %v1613_v8  ;;  %v1615_v26 = vpop.eup %1614 }
 0xc38   :  { %vm978_vm13 = vmor %vm976_vm12, %vm977_vm11  ;;  %v912_v27 = vadd.f32 1.0, %v1615_v26 }
 0xc39   :  { %v973_v15 = vsub.f32 1.0, %v972_v14 }
 0xc3a   :  { %1616 = vrcp.f32 %v912_v27  ;;  %v924_v44 = vand.u32 2147483648, %v912_v27  ;;  %vm918_vm0 = vweird.f32 %v912_v27  ;;  %v922_v47 = vand.u32 2147483647, %v912_v27 }
 0xc3b   :  { %v974_v16 = vmul.f32 %v1613_v8, %v973_v15 }
 0xc3c   :  { %v925_v31 = vor.u32 1.1754944e-38, %v924_v44  ;;  %vm923_vm3 = vcmp.eq.f32.partialorder %v922_v47, 8.507059e+37 }
 0xc3d   :  { %v975_v17 = vadd.f32 %v1613_v8, %v974_v16 }
 0xc3f   :  { %v979_v21 = vsel %vm978_vm13, %v1613_v8, %v975_v17 }
 0xc40   :  { %v984_v24 = vsel %vm981_vm14, %v983_v22, %v979_v21  ;;  %v1617_v28 = vpop.eup %1616 }
 0xc41   :  { %v914_v30 = vmul.f32 %v1617_v28, %v912_v27  ;;  %vm919_vm15 = vweird.f32 %v1617_v28  ;;  %v987_v53 = vmul.f32 %v984_v24, %v2112_v49 }
 0xc42   :  { %vm920_vm2 = vmor %vm918_vm0, %vm919_vm15 }
 0xc43   :  { %v915_v32 = vsub.f32 1.0, %v914_v30 }
 0xc45   :  { %v916_v39 = vmul.f32 %v1617_v28, %v915_v32 }
 0xc47   :  { %v917_v43 = vadd.f32 %v1617_v28, %v916_v39 }
 0xc49   :  { %v921_v48 = vsel %vm920_vm2, %v1617_v28, %v917_v43 }
 0xc4a   :  { %v926_v51 = vsel %vm923_vm3, %v925_v31, %v921_v48 }
 0xc4b   :  { %v929_v57 = vmul.f32 %v926_v51, %v2117_v45 }
 0xc77   :  { %v990_v23 = vpop.permute.xlu1 %989 }
 0xc78   :  { %v992_v25 = vmul.f32 %v990_v23, %v984_v24 }
 0xc7a   :  { %994 = vrot.lane.b32.xlu0 %v992_v25, %s1827_s30 }
 0xc9f   :  { %v932_v50 = vpop.permute.xlu0 %931 }
 0xca0   :  { %v934_v52 = vmul.f32 %v932_v50, %v926_v51 }
 0xca2   :  { %936 = vrot.lane.b32.xlu2 %v934_v52, %s1827_s30 }
 0xcec   :  { %v995_v54 = vpop.permute.xlu0 %994 }
 0xced   :  { %v2146_v55 = vadd.f32 %v995_v54, %v987_v53 }
 0xcef   :  { %1618 = vtanh.f32 %v2146_v55 }
 0xcf5   :  { %v1619_v56 = vpop.eup %1618 }
 0xcf6   :  { %1000 = vrot.lane.b32.xlu2 %v1619_v56, %s1826_s29 }
 0xcfc   :  { %v937_v58 = vpop.permute.xlu2 %936 }
 0xcfd   :  { %v2151_v59 = vadd.f32 %v937_v58, %v929_v57  ;;  %v124_v57 = vld [vmem:[#allocation2 + $0x38] sm:$0xff] }
 0xcfe   :  { %1478 = vmatmul.msk.f32.gmra.mxu0 %vm131_vm1, %v124_v57 }
 0xcff   :  { %1620 = vtanh.f32 %v2151_v59 }
 0xd05   :  { %v1621_v60 = vpop.eup %1620 }
 0xd06   :  { %942 = vrot.lane.b32.xlu1 %v1621_v60, %s1826_s29 }
 0xd50   :  { %v1001_v61 = vpop.permute.xlu2 %1000 }
 0xd51   :  { %v1003_v49 = vmul.f32 %v1001_v61, %v984_v24 }
 0xd53   :  { %1030 = vrot.lane.b32.xlu1 %v1003_v49, %s1827_s30 }
 0xd78   :  { %v943_v62 = vpop.permute.xlu1 %942 }
 0xd79   :  { %v945_v63 = vmul.f32 %v943_v62, %v926_v51 }
 0xd7b   :  { %1005 = vrot.lane.b32.xlu0 %v945_v63, %s1827_s30  ;;  %v198_v49 = vpop.f32.mrf.mxu0 }
 0xdc5   :  { %v1031_v45 = vpop.permute.xlu1 %1030 }
 0xdc6   :  { %1505 = vmatmul.msk.f32.vlgmr.msrb.gmra.mxu3 %vm217_vm6, %v1031_v45  ;;  %1507 = vmatmul.msk.f32.vlgmr.msra.gmra.mxu1 %vm217_vm6, %v1031_v45 }
 0xdc7   :  { %1338 = vmatpush.msrb.mxu3 %v1952_v34  ;;  %v2170_v34 = vld [vmem:[%s2244_s3] ss:$0 sm:$0xff] }
 0xdc8   :  { %v199_v29 = vadd.f32 %v2170_v34, %v198_v49 }
 0xdc9   :  { %1339 = vmatpush.msrb.mxu3 %v1958_v36  ;;  %v196_v36 = vadd.f32 %v2170_v34, %v195_v0  ;;  %v2199_v0 = vld [vmem:[%s2247_s6] ss:$0 sm:$0xff] }
 0xdcb   :  { %1340 = vmatpush.msrb.mxu3 %v1962_v38 }
 0xdcd   :  { %1341 = vmatpush.msrb.mxu3 %v1969_v41 }
 0xded   :  { %v1006_v1 = vpop.permute.xlu0 %1005 }
 0xdee   :  { %1504 = vmatmul.msk.f32.vlgmr.msrb.gmra.mxu2 %vm217_vm6, %v1006_v1 }
 0xdef   :  { %1313 = vmatpush.msrb.mxu2 %v1662_v42 }
 0xdf1   :  { %1314 = vmatpush.msrb.mxu2 %v1663_v3 }
 0xdf3   :  { %1315 = vmatpush.msrb.mxu2 %v1960_v37 }
 0xdf5   :  { %1316 = vmatpush.msrb.mxu2 %v1967_v40 }
 0xe43   :  { %v1109_v38 = vpop.f32.mrf.mxu1 }
 0xe44   :  { %v1112_v41 = vadd.f32 %v1109_v38, %v196_v36 }
 0xe46   :  { %1622 = vtanh.f32 %v1112_v41  ;;  %v1508_v6 = vmul.f32 -1.442695, %v1112_v41 }
 0xe49   :  { %v1051_v4 = vpop.f32.mrf.mxu3 }
 0xe4c   :  { %v1623_v2 = vpop.eup %1622 }
 0xe4d   :  { %1135 = vrot.lane.b32.xlu0 %v1623_v2, %s1826_s29 }
 0xe71   :  { %v1026_v5 = vpop.f32.mrf.mxu2 }
 0xe72   :  { %v1052_v7 = vadd.f32 %v1051_v4, %v1026_v5 }
 0xe74   :  { %v1054_v37 = vadd.f32 %v2002_v46, %v1052_v7 }
 0xe76   :  { %1624 = vtanh.f32 %v1054_v37  ;;  %v1506_v35 = vmul.f32 -1.442695, %v1054_v37 }
 0xe77   :  { %1626 = vpow2.f32 %v1508_v6 }
 0xe7c   :  { %v1625_v40 = vpop.eup %1624 }
 0xe7d   :  { %1077 = vrot.lane.b32.xlu2 %v1625_v40, %s1826_s29  ;;  %v1627_v9 = vpop.eup %1626 }
 0xe7e   :  { %v1116_v10 = vadd.f32 1.0, %v1627_v9 }
 0xe80   :  { %1628 = vrcp.f32 %v1116_v10  ;;  %v1128_v46 = vand.u32 2147483648, %v1116_v10  ;;  %vm1122_vm5 = vweird.f32 %v1116_v10  ;;  %v1126_v16 = vand.u32 2147483647, %v1116_v10 }
 0xe81   :  { %1630 = vpow2.f32 %v1506_v35 }
 0xe82   :  { %v1129_v18 = vor.u32 1.1754944e-38, %v1128_v46  ;;  %vm1127_vm8 = vcmp.eq.f32.partialorder %v1126_v16, 8.507059e+37 }
 0xe86   :  { %v1629_v33 = vpop.eup %1628 }
 0xe87   :  { %v1118_v11 = vmul.f32 %v1629_v33, %v1116_v10  ;;  %v1631_v13 = vpop.eup %1630  ;;  %vm1123_vm4 = vweird.f32 %v1629_v33 }
 0xe88   :  { %v1058_v14 = vadd.f32 1.0, %v1631_v13  ;;  %vm1124_vm7 = vmor %vm1122_vm5, %vm1123_vm4 }
 0xe89   :  { %v1119_v12 = vsub.f32 1.0, %v1118_v11 }
 0xe8a   :  { %1632 = vrcp.f32 %v1058_v14  ;;  %v1070_v27 = vand.u32 2147483648, %v1058_v14  ;;  %vm1064_vm10 = vweird.f32 %v1058_v14  ;;  %v1068_v28 = vand.u32 2147483647, %v1058_v14 }
 0xe8b   :  { %v1120_v8 = vmul.f32 %v1629_v33, %v1119_v12 }
 0xe8c   :  { %v1071_v32 = vor.u32 1.1754944e-38, %v1070_v27  ;;  %vm1069_vm12 = vcmp.eq.f32.partialorder %v1068_v28, 8.507059e+37 }
 0xe8d   :  { %v1121_v15 = vadd.f32 %v1629_v33, %v1120_v8 }
 0xe8f   :  { %v1125_v17 = vsel %vm1124_vm7, %v1629_v33, %v1121_v15 }
 0xe90   :  { %v1130_v20 = vsel %vm1127_vm8, %v1129_v18, %v1125_v17  ;;  %v1633_v22 = vpop.eup %1632 }
 0xe91   :  { %v1060_v23 = vmul.f32 %v1633_v22, %v1058_v14  ;;  %vm1065_vm9 = vweird.f32 %v1633_v22  ;;  %v1133_v47 = vmul.f32 %v1130_v20, %v2146_v55 }
 0xe92   :  { %vm1066_vm11 = vmor %vm1064_vm10, %vm1065_vm9  ;;  %vm1449_vm10 = vcmask 48128  }
 0xe93   :  { %v1061_v24 = vsub.f32 1.0, %v1060_v23 }
 0xe95   :  { %v1062_v25 = vmul.f32 %v1633_v22, %v1061_v24 }
 0xe97   :  { %v1063_v26 = vadd.f32 %v1633_v22, %v1062_v25 }
 0xe99   :  { %v1067_v30 = vsel %vm1066_vm11, %v1633_v22, %v1063_v26 }
 0xe9a   :  { %v1072_v43 = vsel %vm1069_vm12, %v1071_v32, %v1067_v30 }
 0xe9b   :  { %v1075_v51 = vmul.f32 %v1072_v43, %v2151_v59 }
 0xebf   :  { %v1136_v19 = vpop.permute.xlu0 %1135 }
 0xec0   :  { %v1138_v21 = vmul.f32 %v1136_v19, %v1130_v20 }
 0xec2   :  { %1140 = vrot.lane.b32.xlu2 %v1138_v21, %s1827_s30 }
 0xed7   :  { %v1078_v39 = vpop.permute.xlu2 %1077 }
 0xed8   :  { %v1080_v44 = vmul.f32 %v1078_v39, %v1072_v43 }
 0xeda   :  { %1082 = vrot.lane.b32.xlu1 %v1080_v44, %s1827_s30 }
 0xf1c   :  { %v1141_v48 = vpop.permute.xlu2 %1140 }
 0xf1d   :  { %v2179_v31 = vadd.f32 %v1141_v48, %v1133_v47 }
 0xf1f   :  { %1634 = vtanh.f32 %v2179_v31 }
 0xf25   :  { %v1635_v50 = vpop.eup %1634 }
 0xf26   :  { %1146 = vrot.lane.b32.xlu1 %v1635_v50, %s1826_s29 }
 0xf4c   :  { %v1083_v52 = vpop.permute.xlu1 %1082 }
 0xf4d   :  { %v2184_v53 = vadd.f32 %v1083_v52, %v1075_v51 }
 0xf4f   :  { %1636 = vtanh.f32 %v2184_v53 }
 0xf55   :  { %v1637_v54 = vpop.eup %1636 }
 0xf56   :  { %1088 = vrot.lane.b32.xlu0 %v1637_v54, %s1826_s29 }
 0xf98   :  { %v1147_v56 = vpop.permute.xlu1 %1146 }
 0xf99   :  { %v1149_v55 = vmul.f32 %v1147_v56, %v1130_v20 }
 0xf9b   :  { %1176 = vrot.lane.b32.xlu0 %v1149_v55, %s1827_s30 }
 0xfc8   :  { %v1089_v58 = vpop.permute.xlu0 %1088 }
 0xfc9   :  { %v1091_v60 = vmul.f32 %v1089_v58, %v1072_v43 }
 0xfcb   :  { %1151 = vrot.lane.b32.xlu2 %v1091_v60, %s1827_s30 }
0x100d   :  { %v1177_v59 = vpop.permute.xlu0 %1176 }
0x100e   :  { %1510 = vmatmul.msk.f32.vlgmr.msra.gmra.mxu3 %vm217_vm6, %v1177_v59  ;;  %1512 = vmatmul.msk.f32.vlgmr.msrb.gmra.mxu1 %vm217_vm6, %v1177_v59 }
0x1025   :  { %v1152_v61 = vpop.permute.xlu2 %1151 }
0x1026   :  { %1509 = vmatmul.msk.f32.vlgmr.msra.gmra.mxu2 %vm217_vm6, %v1152_v61 }
0x108b   :  { %v1255_v62 = vpop.f32.mrf.mxu1 }
0x108c   :  { %v1258_v63 = vadd.f32 %v1255_v62, %v199_v29 }
0x108e   :  { %1638 = vtanh.f32 %v1258_v63  ;;  %v1513_v34 = vmul.f32 -1.442695, %v1258_v63 }
0x1091   :  { %v1197_v1 = vpop.f32.mrf.mxu3 }
0x1094   :  { %v1639_v45 = vpop.eup %1638 }
0x1095   :  { %1281 = vrot.lane.b32.xlu2 %v1639_v45, %s1826_s29 }
0x10a9   :  { %v1172_v42 = vpop.f32.mrf.mxu2 }
0x10aa   :  { %v1198_v3 = vadd.f32 %v1197_v1, %v1172_v42 }
0x10ac   :  { %v1200_v36 = vadd.f32 %v2199_v0, %v1198_v3 }
0x10ae   :  { %1640 = vtanh.f32 %v1200_v36  ;;  %v1511_v13 = vmul.f32 -1.442695, %v1200_v36 }
0x10af   :  { %1642 = vpow2.f32 %v1513_v34 }
0x10b4   :  { %v1641_v38 = vpop.eup %1640 }
0x10b5   :  { %1223 = vrot.lane.b32.xlu1 %v1641_v38, %s1826_s29  ;;  %v1643_v41 = vpop.eup %1642 }
0x10b6   :  { %v1262_v2 = vadd.f32 1.0, %v1643_v41 }
0x10b8   :  { %1644 = vrcp.f32 %v1262_v2  ;;  %v1274_v6 = vand.u32 2147483648, %v1262_v2  ;;  %vm1268_vm13 = vweird.f32 %v1262_v2  ;;  %v1272_v9 = vand.u32 2147483647, %v1262_v2 }
0x10b9   :  { %1646 = vpow2.f32 %v1511_v13  ;;  %v1532_v13 = vld [vmem:[%s2249_s8] ss:$0 sm:$0xff] }
0x10ba   :  { %v1275_v33 = vor.u32 1.1754944e-38, %v1274_v6  ;;  %vm1273_vm15 = vcmp.eq.f32.partialorder %v1272_v9, 8.507059e+37 }
0x10be   :  { %v1645_v4 = vpop.eup %1644 }
0x10bf   :  { %v1264_v5 = vmul.f32 %v1645_v4, %v1262_v2  ;;  %vm1269_vm1 = vweird.f32 %v1645_v4  ;;  %v1647_v8 = vpop.eup %1646 }
0x10c0   :  { %vm1270_vm14 = vmor %vm1268_vm13, %vm1269_vm1  ;;  %v1204_v14 = vadd.f32 1.0, %v1647_v8 }
0x10c1   :  { %v1265_v7 = vsub.f32 1.0, %v1264_v5  ;;  %v1387_v5 = vld [vmem:[#allocation10 + $0x18] sm:$0xff] }
0x10c2   :  { %1648 = vrcp.f32 %v1204_v14  ;;  %v1216_v19 = vand.u32 2147483648, %v1204_v14  ;;  %vm1210_vm2 = vweird.f32 %v1204_v14  ;;  %v1214_v20 = vand.u32 2147483647, %v1204_v14  ;;  %1409 = vmatpush.msrb.mxu0 %v1387_v5 }
0x10c3   :  { %v1266_v37 = vmul.f32 %v1645_v4, %v1265_v7  ;;  %v1386_v7 = vld [vmem:[#allocation10 + $0x10] sm:$0xff] }
0x10c4   :  { %v1217_v22 = vor.u32 1.1754944e-38, %v1216_v19  ;;  %vm1215_vm4 = vcmp.eq.f32.partialorder %v1214_v20, 8.507059e+37  ;;  %1410 = vmatpush.msrb.mxu0 %v1386_v7 }
0x10c5   :  { %v1267_v40 = vadd.f32 %v1645_v4, %v1266_v37  ;;  %v1385_v37 = vld [vmem:[#allocation10 + $0x8] sm:$0xff] }
0x10c6   :  { %1411 = vmatpush.msrb.mxu0 %v1385_v37 }
0x10c7   :  { %v1271_v10 = vsel %vm1270_vm14, %v1645_v4, %v1267_v40  ;;  %v1384_v40 = vld [vmem:[#allocation10] sm:$0xff] }
0x10c8   :  { %v1276_v11 = vsel %vm1273_vm15, %v1275_v33, %v1271_v10  ;;  %v1649_v15 = vpop.eup %1648  ;;  %1412 = vmatpush.msrb.mxu0 %v1384_v40  ;;  %v1421_v10 = vld [vmem:[%s2250_s9 + $0x18] sm:$0xff]  ;;  %v1420_v33 = vld [vmem:[%s2250_s9 + $0x10] sm:$0xff] }
0x10c9   :  { %v1206_v46 = vmul.f32 %v1649_v15, %v1204_v14  ;;  %vm1211_vm0 = vweird.f32 %v1649_v15  ;;  %v1279_v26 = vmul.f32 %v1276_v11, %v2179_v31  ;;  %1441 = vmatpush.msra.mxu1 %v1421_v10 }
0x10ca   :  { %vm1212_vm3 = vmor %vm1210_vm2, %vm1211_vm0 }
0x10cb   :  { %v1207_v16 = vsub.f32 1.0, %v1206_v46  ;;  %1442 = vmatpush.msra.mxu1 %v1420_v33  ;;  %v1533_v46 = vld [vmem:[%s2251_s10] ss:$0 sm:$0xff] }
0x10cd   :  { %v1208_v17 = vmul.f32 %v1649_v15, %v1207_v16 }
0x10cf   :  { %v1209_v18 = vadd.f32 %v1649_v15, %v1208_v17 }
0x10d1   :  { %v1213_v21 = vsel %vm1212_vm3, %v1649_v15, %v1209_v18 }
0x10d2   :  { %v1218_v24 = vsel %vm1215_vm4, %v1217_v22, %v1213_v21 }
0x10d3   :  { %v1221_v32 = vmul.f32 %v1218_v24, %v2184_v53 }
0x10ef   :  { %v1282_v35 = vpop.permute.xlu2 %1281 }
0x10f0   :  { %v1284_v12 = vmul.f32 %v1282_v35, %v1276_v11 }
0x10f2   :  { %1286 = vrot.lane.b32.xlu1 %v1284_v12, %s1827_s30  ;;  %v1418_v12 = vld [vmem:[%s2250_s9] sm:$0xff] }
0x1127   :  { %v1224_v23 = vpop.permute.xlu1 %1223 }
0x1128   :  { %v1226_v25 = vmul.f32 %v1224_v23, %v1218_v24 }
0x112a   :  { %1228 = vrot.lane.b32.xlu0 %v1226_v25, %s1827_s30 }
0x1164   :  { %v1287_v27 = vpop.permute.xlu1 %1286 }
0x1165   :  { %v1289_v28 = vadd.f32 %v1287_v27, %v1279_v26 }
0x1167   :  { %1650 = vtanh.f32 %v1289_v28 }
0x116d   :  { %v1651_v30 = vpop.eup %1650 }
0x116e   :  { %1292 = vrot.lane.b32.xlu0 %v1651_v30, %s1826_s29 }
0x119c   :  { %v1229_v39 = vpop.permute.xlu0 %1228 }
0x119d   :  { %v1231_v43 = vadd.f32 %v1229_v39, %v1221_v32 }
0x119f   :  { %1652 = vtanh.f32 %v1231_v43 }
0x11a5   :  { %v1653_v44 = vpop.eup %1652 }
0x11a6   :  { %1234 = vrot.lane.b32.xlu2 %v1653_v44, %s1826_s29 }
0x11e0   :  { %v1293_v47 = vpop.permute.xlu0 %1292 }
0x11e1   :  { %v1295_v48 = vmul.f32 %v1293_v47, %v1276_v11  ;;  %v1419_v11 = vld [vmem:[%s2250_s9 + $0x8] sm:$0xff]  ;;  %s1458_s9 = sshll.u32 %s2252_s11, 4  ;;  %s1459_s9 = int_to_ptr.hbm [resolvable:$true] %s1458_s9 }
0x11e2   :  { %1443 = vmatpush.msra.mxu1 %v1419_v11 }
0x11e3   :  { %1322 = vrot.lane.b32.xlu2 %v1295_v48, %s1827_s30 }
0x11e4   :  { %1444 = vmatpush.msra.mxu1 %v1418_v12 }
0x1200   :  { %v1235_v50 = vpop.permute.xlu2 %1234 }
0x1201   :  { %v1237_v31 = vmul.f32 %v1235_v50, %v1218_v24 }
0x1203   :  { %1297 = vrot.lane.b32.xlu1 %v1237_v31, %s1827_s30 }
0x123d   :  { %v1323_v51 = vpop.permute.xlu2 %1322 }
0x123e   :  { %1515 = vmatmul.msk.f32.vlgmr.msrb.gmra.mxu3 %vm217_vm6, %v1323_v51 }
0x1275   :  { %v1298_v52 = vpop.permute.xlu1 %1297 }
0x1276   :  { %1514 = vmatmul.msk.f32.vlgmr.msrb.gmra.mxu2 %vm217_vm6, %v1298_v52 }
0x12c1   :  { %v1343_v53 = vpop.f32.mrf.mxu3 }
0x12f9   :  { %v1318_v54 = vpop.f32.mrf.mxu2 }
0x12fa   :  { %v1344_v56 = vadd.f32 %v1343_v53, %v1318_v54 }
0x12fc   :  { %v1346_v55 = vadd.f32 %v2199_v0, %v1344_v56 }
0x12fe   :  { %1654 = vtanh.f32 %v1346_v55  ;;  %v1516_v58 = vmul.f32 -1.442695, %v1346_v55 }
0x1300   :  { %1656 = vpow2.f32 %v1516_v58 }
0x1304   :  { %v1655_v57 = vpop.eup %1654 }
0x1305   :  { %1369 = vrot.lane.b32.xlu0 %v1655_v57, %s1826_s29 }
0x1306   :  { %v1657_v60 = vpop.eup %1656 }
0x1307   :  { %v1350_v59 = vadd.f32 1.0, %v1657_v60 }
0x1309   :  { %1658 = vrcp.f32 %v1350_v59  ;;  %v1362_v45 = vand.u32 2147483648, %v1350_v59  ;;  %vm1356_vm7 = vweird.f32 %v1350_v59  ;;  %v1360_v1 = vand.u32 2147483647, %v1350_v59 }
0x130b   :  { %v1363_v3 = vor.u32 1.1754944e-38, %v1362_v45  ;;  %vm1361_vm9 = vcmp.eq.f32.partialorder %v1360_v1, 8.507059e+37 }
0x130f   :  { %v1659_v61 = vpop.eup %1658 }
0x1310   :  { %v1352_v49 = vmul.f32 %v1659_v61, %v1350_v59  ;;  %vm1357_vm5 = vweird.f32 %v1659_v61 }
0x1311   :  { %vm1358_vm8 = vmor %vm1356_vm7, %vm1357_vm5 }
0x1312   :  { %v1353_v29 = vsub.f32 1.0, %v1352_v49 }
0x1314   :  { %v1354_v62 = vmul.f32 %v1659_v61, %v1353_v29 }
0x1316   :  { %v1355_v63 = vadd.f32 %v1659_v61, %v1354_v62 }
0x1318   :  { %v1359_v42 = vsel %vm1358_vm8, %v1659_v61, %v1355_v63 }
0x1319   :  { %v1364_v36 = vsel %vm1361_vm9, %v1363_v3, %v1359_v42 }
0x131a   :  { %v1367_v34 = vmul.f32 %v1364_v36, %v1231_v43 }
0x1377   :  { %v1370_v0 = vpop.permute.xlu0 %1369 }
0x1378   :  { %v1372_v38 = vmul.f32 %v1370_v0, %v1364_v36 }
0x137a   :  { %1374 = vrot.lane.b32.xlu1 %v1372_v38, %s1827_s30 }
0x13ec   :  { %v1375_v41 = vpop.permute.xlu1 %1374 }
0x13ed   :  { %v1377_v2 = vadd.f32 %v1375_v41, %v1367_v34 }
0x13ef   :  { %1660 = vtanh.f32 %v1377_v2 }
0x13f5   :  { %v1661_v4 = vpop.eup %1660 }
0x13f6   :  { %1380 = vrot.lane.b32.xlu2 %v1661_v4, %s1826_s29 }
0x1450   :  { %v1381_v6 = vpop.permute.xlu2 %1380 }
0x1451   :  { %v1383_v9 = vmul.f32 %v1381_v6, %v1364_v36 }
0x1453   :  { %1393 = vrot.lane.b32.xlu0 %v1383_v9, %s1827_s30 }
0x14c5   :  { %v1394_v35 = vpop.permute.xlu0 %1393 }
0x14c6   :  { %1517 = vmatmul.msk.f32.vlgmr.msrb.gmra.mxu0 %vm217_vm6, %v1394_v35 }
0x1543   :  { %v1414_v8 = vpop.f32.mrf.mxu0 }
0x1544   :  { %v1415_v14 = vadd.f32 %v1532_v13, %v1414_v8 }
0x1546   :  { %v1417_v15 = vmax.f32 %v1415_v14, 0.0 }
0x1548   :  { %1518 = vmatmul.msk.f32.vlgmr.msra.gmra.mxu1 %vm217_vm6, %v1417_v15 }
0x15c5   :  { %v1446_v16 = vpop.f32.mrf.mxu1 }
0x15c6   :  { %v1447_v17 = vadd.f32 %v1533_v46, %v1446_v16 }
0x15c8   :  { %1450 = vst.msk [vmem:[#allocation11] sm:$0xff] %vm1449_vm10, %v1447_v17 }
0x15c9   :  { %1461 = dma.vmem_to_hbm [thread:$0]  %s1457_s24, 128, %s1459_s9, [#allocation4]  }
0x15ca   :  { %1816 = dma.done.wait [#allocation4], 128  }
0x15cb   :  { %1817 = vsyncadd [#allocation4], 4294967168 }
0x15cc   :  { %1466 = vsyncpa [#allocation3], 1 }
0x15cd   :  { %1467 = vsyncpa [#allocation6], 1 }
0x15ce   :  { %1468 = vsyncpa [#allocation9], 1 }
0x15cf   :  { %1469 = vsyncpa [#allocation4], 1 }

</bundles_post_ra>
